<compile_context>
chip_gen: v7x
topology: tpu7x:2x2x1
jax: 0.10.0
libtpu: 0.0.40
codegen_flags: <defaults>
</compile_context>

<pallas_src>
import functools

import jax
import jax.numpy as jnp
from jax.experimental import pallas as pl
from jax.experimental.pallas import tpu as pltpu


# --------------------------------------------------------------------------- kernel ---

def _pos_embed_kernel(x_ref, w1_ref, b1_ref, w2_ref, b2_ref, o_ref):
    """Fused position-embedding MLP for one (batch, n_q-tile).

    x_ref : [C_in, tn]   compute dtype (e.g. bf16)
    w1_ref: [F, C_in]    compute dtype (BN scale folded in)
    b1_ref: [F, 1]       f32 (conv1 bias + BN shift folded)
    w2_ref: [F, F]       compute dtype
    b2_ref: [F, 1]       f32
    o_ref : [F, tn]      f32
    """
    # Conv1d #1 (pointwise) with folded BN scale: [F, C_in] @ [C_in, tn] -> [F, tn]
    h = jnp.dot(w1_ref[...], x_ref[...], preferred_element_type=jnp.float32)
    # Folded bias/BN shift + ReLU (f32 epilogue, broadcasts [F,1] over lanes).
    h = jnp.maximum(h + b1_ref[...], 0.0)
    # Conv1d #2 (pointwise): [F, F] @ [F, tn] -> [F, tn]; MXU N dim = tn (>= 128).
    y = jnp.dot(w2_ref[...], h.astype(w2_ref.dtype),
                preferred_element_type=jnp.float32)
    o_ref[...] = (y + b2_ref[...]).astype(o_ref.dtype)


def _pick_tn(n_q_padded, max_tn=1024):
    """Largest lane tile (multiple of 128, <= max_tn) that divides n_q_padded."""
    for cand in (1024, 512, 256, 128):
        if cand <= max_tn and n_q_padded % cand == 0:
            return cand
    return 128


@functools.partial(jax.jit, static_argnames=("tn", "compute_dtype"))
def position_embedding_learned(xyz, params, *, tn=None, compute_dtype=jnp.bfloat16):
    """xyz: [B, n_q, C_in] (matches the PyTorch forward input) -> [B, F, n_q] (f32)."""
    B, n_q, c_in = xyz.shape
    w1f, b1f, w2, b2 = params["w1f"], params["b1f"], params["w2"], params["b2"]
    num_feats = w2.shape[0]
    assert num_feats % 8 == 0, "num_pos_feats must be a multiple of 8 (sublane axis)"

    # Same transpose the PyTorch module performs (tiny tensor -> negligible cost);
    # after this point the kernel never transposes and writes [B, F, n_q] directly.
    xt = jnp.transpose(xyz, (0, 2, 1)).astype(compute_dtype)          # [B, C_in, n_q]

    # Pad n_q up to a multiple of 128 so every tile is lane-dense; padded lanes are
    # sliced off at the end (their values are never observed).
    n_q_padded = pl.cdiv(n_q, 128) * 128
    if n_q_padded != n_q:
        xt = jnp.pad(xt, ((0, 0), (0, 0), (0, n_q_padded - n_q)))

    if tn is None:
        tn = _pick_tn(n_q_padded)
    assert n_q_padded % tn == 0 and tn % 128 == 0

    grid = (B, n_q_padded // tn)

    out = pl.pallas_call(
        _pos_embed_kernel,
        out_shape=jax.ShapeDtypeStruct((B, num_feats, n_q_padded), jnp.float32),
        grid_spec=pltpu.PrefetchScalarGridSpec(
            num_scalar_prefetch=0,
            grid=grid,
            in_specs=[
                # per-(batch, tile) input slab, lanes = n_q tile
                pl.BlockSpec((None, c_in, tn), lambda b, j: (b, 0, j)),
                # resident parameters (constant index_map -> fetched once, kept in VMEM)
                pl.BlockSpec((num_feats, c_in), lambda b, j: (0, 0)),
                pl.BlockSpec((num_feats, 1), lambda b, j: (0, 0)),
                pl.BlockSpec((num_feats, num_feats), lambda b, j: (0, 0)),
                pl.BlockSpec((num_feats, 1), lambda b, j: (0, 0)),
            ],
            out_specs=pl.BlockSpec((None, num_feats, tn), lambda b, j: (b, 0, j)),
        ),
        compiler_params=pltpu.CompilerParams(
            dimension_semantics=("parallel", "parallel")),
    )(xt, w1f.astype(compute_dtype), b1f, w2.astype(compute_dtype), b2)

    if n_q_padded != n_q:
        out = out[:, :, :n_q]
    return out


# ---------------------------------------------------------------------- parameters ---

def make_position_embedding_params(key, input_channel, num_pos_feats=288, eps=1e-5):
    """Deterministic synthetic parameters mirroring PositionEmbeddingLearned.__init__.

    Conv1d weights are stored in matmul form [out, in]; BatchNorm1d (eval mode) and the
    first conv's bias are folded into (w1f, b1f).
    """
    k1, k2, k3, k4, k5, k6, k7, k8 = jax.random.split(key, 8)
    w1 = jax.random.normal(k1, (num_pos_feats, input_channel), jnp.float32) / jnp.sqrt(
        float(input_channel))
    b1 = 0.1 * jax.random.normal(k2, (num_pos_feats,), jnp.float32)
    gamma = 1.0 + 0.01 * jax.random.normal(k3, (num_pos_feats,), jnp.float32)
    beta = 0.01 * jax.random.normal(k4, (num_pos_feats,), jnp.float32)
    running_mean = 0.1 * jax.random.normal(k5, (num_pos_feats,), jnp.float32)
    running_var = 1.0 + 0.1 * jax.random.uniform(k6, (num_pos_feats,), jnp.float32)
    w2 = jax.random.normal(k7, (num_pos_feats, num_pos_feats), jnp.float32) / jnp.sqrt(
        float(num_pos_feats))
    b2 = 0.1 * jax.random.normal(k8, (num_pos_feats,), jnp.float32)

    # BN eval-mode affine: y = scale * x + shift
    scale = gamma / jnp.sqrt(running_var + eps)
    shift = beta - running_mean * scale
    # Fold BN + conv1 bias:  scale*(W1 x + b1) + shift = (scale[:,None]*W1) x + (scale*b1 + shift)
    w1f = w1 * scale[:, None]
    b1f = scale * b1 + shift
    return dict(
        w1f=w1f,                                   # [F, C_in]
        b1f=b1f.reshape(num_pos_feats, 1),         # [F, 1]
        w2=w2,                                     # [F, F]
        b2=b2.reshape(num_pos_feats, 1),           # [F, 1]
    )


# ----------------------------------------------------------------------- reference ---

def _reference_forward(xyz, params, compute_dtype=jnp.float32):
    """Plain-JAX reference with the same (optional) MXU-operand cast as the kernel."""
    w1f = params["w1f"].astype(compute_dtype)
    w2 = params["w2"].astype(compute_dtype)
    xt = jnp.transpose(xyz, (0, 2, 1)).astype(compute_dtype)          # [B, C_in, n_q]
    h = jnp.einsum("fc,bcq->bfq", w1f, xt, preferred_element_type=jnp.float32)
    h = jnp.maximum(h + params["b1f"][None, :, :], 0.0)
    y = jnp.einsum("gf,bfq->bgq", w2, h.astype(compute_dtype),
                   preferred_element_type=jnp.float32)
    return y + params["b2"][None, :, :]


def _check(xyz, params):
    out = jax.block_until_ready(position_embedding_learned(xyz, params))
    B, n_q, _ = xyz.shape
    F = params["w2"].shape[0]
    assert out.shape == (B, F, n_q), out.shape

    # Tight check vs a reference using the same bf16 MXU operands / f32 accumulation.
    ref_matched = _reference_forward(xyz, params, compute_dtype=jnp.bfloat16)
    err = float(jnp.max(jnp.abs(out - ref_matched)))
    assert err < 1e-3, ("matched-precision mismatch", err)

    # Loose semantic sanity check vs a full-f32 reference (bf16 MXU rounding only).
    ref_f32 = _reference_forward(xyz, params, compute_dtype=jnp.float32)
    rel = float(jnp.max(jnp.abs(out - ref_f32)) / (jnp.max(jnp.abs(ref_f32)) + 1e-6))
    assert rel < 5e-2, ("f32-reference relative error too large", rel)


# ----------------------------------------------------------------------------- main ---

if __name__ == "__main__":
    # Small shapes consistent with the module's forward: xyz is [B, n_q, C_in=2].
    B, NQ, C_IN = 2, 256, 2
    NUM_POS_FEATS = 288  # module default

    key = jax.random.PRNGKey(0)
    key, pkey, xkey, xkey2 = jax.random.split(key, 4)
    params = make_position_embedding_params(pkey, C_IN, NUM_POS_FEATS)

    # Case 1: n_q already a multiple of 128 (no padding path).
    xyz = jax.random.uniform(xkey, (B, NQ, C_IN), jnp.float32)  # normalized coordinates
    _check(xyz, params)

    # Case 2: ragged query count -> exercises the lane-padding path.
    xyz_ragged = jax.random.uniform(xkey2, (B, 200, C_IN), jnp.float32)
    _check(xyz_ragged, params)

    print("KERNEL_OK")
</pallas_src>

<mosaic_0001>
module attributes {stable_mosaic.version = 11 : i64} {
  func.func @_pos_embed_kernel(%arg0: i32, %arg1: i32, %arg2: memref<1x2x256xbf16, #tpu.memory_space<vmem>>, %arg3: memref<288x2xbf16, #tpu.memory_space<vmem>>, %arg4: memref<288x1xf32, #tpu.memory_space<vmem>>, %arg5: memref<288x288xbf16, #tpu.memory_space<vmem>>, %arg6: memref<288x1xf32, #tpu.memory_space<vmem>>, %arg7: memref<1x288x256xf32, #tpu.memory_space<vmem>>) attributes {dimension_semantics = [#tpu.dimension_semantics<parallel>, #tpu.dimension_semantics<parallel>], iteration_bounds = array<i64: 2, 1>, scalar_prefetch = 0 : i64, scratch_operands = 0 : i64, tpu.core_type = #tpu.core_type<tc>, window_params = [{transform_indices = @transform_0, window_bounds = array<i64: 1, 2, 256>}, {pipeline_mode = #tpu.pipeline_mode<synchronous>, transform_indices = @transform_1, window_bounds = array<i64: 288, 2>}, {pipeline_mode = #tpu.pipeline_mode<synchronous>, transform_indices = @transform_2, window_bounds = array<i64: 288, 1>}, {pipeline_mode = #tpu.pipeline_mode<synchronous>, transform_indices = @transform_3, window_bounds = array<i64: 288, 288>}, {pipeline_mode = #tpu.pipeline_mode<synchronous>, transform_indices = @transform_4, window_bounds = array<i64: 288, 1>}, {transform_indices = @transform_5, window_bounds = array<i64: 1, 288, 256>}]} {
    %c0 = arith.constant 0 : index
    %c0_0 = arith.constant 0 : index
    %0 = vector.load %arg3[%c0, %c0_0] : memref<288x2xbf16, #tpu.memory_space<vmem>>, vector<288x2xbf16>
    %c0_1 = arith.constant 0 : index
    %c0_2 = arith.constant 0 : index
    %c0_3 = arith.constant 0 : index
    %1 = vector.load %arg2[%c0_1, %c0_2, %c0_3] : memref<1x2x256xbf16, #tpu.memory_space<vmem>>, vector<1x2x256xbf16>
    %2 = vector.shape_cast %1 : vector<1x2x256xbf16> to vector<2x256xbf16>
    %cst = arith.constant dense<0.000000e+00> : vector<288x256xf32>
    %3 = tpu.matmul %0, %2, %cst {dimension_numbers = #tpu.dot_dimension_numbers<[1], [0], [0], [1], [0, 0, 1, 1], [], []>} : vector<288x2xbf16>, vector<2x256xbf16>, vector<288x256xf32> -> vector<288x256xf32>
    %c0_4 = arith.constant 0 : index
    %c0_5 = arith.constant 0 : index
    %4 = vector.load %arg4[%c0_4, %c0_5] : memref<288x1xf32, #tpu.memory_space<vmem>>, vector<288x1xf32>
    %5 = vector.broadcast %4 : vector<288x1xf32> to vector<288x256xf32>
    %6 = arith.addf %3, %5 : vector<288x256xf32>
    %cst_6 = arith.constant 0.000000e+00 : f32
    %7 = vector.broadcast %cst_6 : f32 to vector<288x256xf32>
    %8 = arith.maximumf %6, %7 : vector<288x256xf32>
    %c0_7 = arith.constant 0 : index
    %c0_8 = arith.constant 0 : index
    %9 = vector.load %arg5[%c0_7, %c0_8] : memref<288x288xbf16, #tpu.memory_space<vmem>>, vector<288x288xbf16>
    %10 = arith.truncf %8 : vector<288x256xf32> to vector<288x256xbf16>
    %cst_9 = arith.constant dense<0.000000e+00> : vector<288x256xf32>
    %11 = tpu.matmul %9, %10, %cst_9 {dimension_numbers = #tpu.dot_dimension_numbers<[1], [0], [0], [1], [0, 0, 1, 1], [], []>} : vector<288x288xbf16>, vector<288x256xbf16>, vector<288x256xf32> -> vector<288x256xf32>
    %c0_10 = arith.constant 0 : index
    %c0_11 = arith.constant 0 : index
    %12 = vector.load %arg6[%c0_10, %c0_11] : memref<288x1xf32, #tpu.memory_space<vmem>>, vector<288x1xf32>
    %13 = vector.broadcast %12 : vector<288x1xf32> to vector<288x256xf32>
    %14 = arith.addf %11, %13 : vector<288x256xf32>
    %c0_12 = arith.constant 0 : index
    %c0_13 = arith.constant 0 : index
    %c0_14 = arith.constant 0 : index
    %15 = vector.load %arg7[%c0_12, %c0_13, %c0_14] : memref<1x288x256xf32, #tpu.memory_space<vmem>>, vector<1x288x256xf32>
    %16 = vector.shape_cast %15 : vector<1x288x256xf32> to vector<288x256xf32>
    %17 = vector.shape_cast %14 : vector<288x256xf32> to vector<1x288x256xf32>
    tpu.vector_store %arg7[%c0_12, %c0_13, %c0_14], %17 {strides = array<i32>} : memref<1x288x256xf32, #tpu.memory_space<vmem>>, vector<1x288x256xf32>,
    return
  }
  func.func @transform_0(%arg0: i32, %arg1: i32) -> (i32, i32, i32) {
    %c0_i32 = arith.constant 0 : i32
    %c0_i32_0 = arith.constant 0 : i32
    return %arg0, %c0_i32, %arg1 : i32, i32, i32
  }
  func.func @transform_1(%arg0: i32, %arg1: i32) -> (i32, i32) {
    %c0_i32 = arith.constant 0 : i32
    %c0_i32_0 = arith.constant 0 : i32
    %c0_i32_1 = arith.constant 0 : i32
    return %c0_i32, %c0_i32_0 : i32, i32
  }
  func.func @transform_2(%arg0: i32, %arg1: i32) -> (i32, i32) {
    %c0_i32 = arith.constant 0 : i32
    %c0_i32_0 = arith.constant 0 : i32
    %c0_i32_1 = arith.constant 0 : i32
    return %c0_i32, %c0_i32_0 : i32, i32
  }
  func.func @transform_3(%arg0: i32, %arg1: i32) -> (i32, i32) {
    %c0_i32 = arith.constant 0 : i32
    %c0_i32_0 = arith.constant 0 : i32
    %c0_i32_1 = arith.constant 0 : i32
    return %c0_i32, %c0_i32_0 : i32, i32
  }
  func.func @transform_4(%arg0: i32, %arg1: i32) -> (i32, i32) {
    %c0_i32 = arith.constant 0 : i32
    %c0_i32_0 = arith.constant 0 : i32
    %c0_i32_1 = arith.constant 0 : i32
    return %c0_i32, %c0_i32_0 : i32, i32
  }
  func.func @transform_5(%arg0: i32, %arg1: i32) -> (i32, i32, i32) {
    %c0_i32 = arith.constant 0 : i32
    %c0_i32_0 = arith.constant 0 : i32
    return %arg0, %c0_i32, %arg1 : i32, i32, i32
  }
}

</mosaic_0001>

<bundles_post_ra>
// kernel: position_embedding_learned.1
= control target key start
LH: loop header
LB: loop body
LE: loop exit
PB: predicated region body
PF: predicated region fallthrough
CT: control target
= control target key end

     0   :  { %10 = vsyncpa [#allocation3], 0  ;;  %s3587_s0 = inlined_call_operand.vmem [shape: bf16[2,2,256], index: 0, kind: input, shape index: {}]   ;;  %s3588_s1 = inlined_call_operand.vmem [shape: bf16[288,2], index: 1, kind: input, shape index: {}]   ;;  %s3589_s2 = inlined_call_operand.vmem [shape: f32[288,1], index: 2, kind: input, shape index: {}]   ;;  %s3590_s3 = inlined_call_operand.vmem [shape: bf16[288,288], index: 3, kind: input, shape index: {}]   ;;  %s3591_s4 = inlined_call_operand.vmem [shape: f32[288,1], index: 4, kind: input, shape index: {}]   ;;  %s3592_s5 = inlined_call_operand.hbm [shape: f32[2,288,256], index: 5, kind: output, shape index: {}]  }
   0x1   :  { %12 = vsyncpa [#allocation3 + $0x1], 0  ;;  %s2767_s18 = smov 0   ;;  %s2769_s19 = smov 0  }
   0x2   :  { %s2771_s20 = smov 0   ;;  %s2773_s21 = smov 0  }
   0x3   :  { %s2775_s22 = smov 0   ;;  %s2777_s23 = smov 0  }
   0x4 LB: > { %s2204_s24 = sadd.s32 4294967295, %s2730_s23   ;;  %s2205_s25 = sadd.s32 4294967294, %s2730_s23   ;;  %s2730_s23 = sphi %s2777_s23, %s18_s23   ;;  %s2726_s22 = sphi %s2775_s22, %s3599_s22   ;;  %s2722_s21 = sphi %s2773_s21, %s3598_s21   ;;  %s2718_s20 = sphi %s2771_s20, %s3597_s20   ;;  %s2714_s19 = sphi %s2769_s19, %s3596_s19   ;;  %s2710_s18 = sphi %s2767_s18, %s3595_s18  }
   0x5   : > { %s30_s26 = sadd.s32 1, %s2726_s22  ;;  %s151_s27 = sadd.s32 1, %s2718_s20 }
   0x6   : > { %p32_p0 = scmp.ge.s32.totalorder %s30_s26, 2  ;;  %p161_p1 = scmp.ne.s32.totalorder %s2718_s20, %s2714_s19 }
   0x7   : > { %p162_p2 = scmp.eq.s32.totalorder %s2204_s24, 1  ;;  %p167_p3 = scmp.ne.s32.totalorder %s2714_s19, %s2710_s18 }
   0x8   : > { %s3601_s26 = smov (%p32_p0, %s30_s26), 0  ;;  %p168_p5 = scmp.eq.s32.totalorder %s2205_s25, 1 }
   0x9   : > { %p2807_p4 = por %p162_p2, %p161_p1  ;;  %s146_s29 = ssub.s32 %s2726_s22, %s3601_s26 }
   0xa   : > { %p2208_p6 = scmp.ge.s32.totalorder %s2730_s23, 1  ;;  %p149_p7 = scmp.eq.s32.totalorder %s146_s29, 0 }
   0xb   : > { %p2814_p8 = por %p168_p5, %p167_p3  ;;  %p210_p9 = scmp.lt.s32.totalorder %s2730_s23, 3 }
   0xc   : > { %s2820_s6 = scalar_select %p149_p7, %s2718_s20, %s151_s27  }
   0xd   : > { %p211_p10 = pnand %p2208_p6, %p210_p9 }
   0xe   : > { %p242_p11 = scmp.lt.s32.totalorder (!%p211_p10), %s2722_s21, 1  ;;  %v607_v0 = vlaneseq (!%p211_p10)  ;;  %v2732_v1 = vmov (!%p211_p10), 1966171168   ;;  %v2733_v3 = vmov (!%p211_p10), 0   ;;  %v289_v4 = vld [vmem:[%s3589_s2] sm:$0xff] (!%p211_p10)  ;;  %v291_v7 = vld [vmem:[%s3589_s2 + $0x10] sm:$0xff] (!%p211_p10) }
   0xf   : > { %214 = sbr.rel (%p211_p10) target bundleno = 796 (0x31c), region = 40  ;;  %v605_v2 = vunpack.c.l.s4 (!%p211_p10), %v2732_v1  ;;  %712 = vmatprep.mubr.bf16.mxu0 (!%p211_p10), %v2733_v3  ;;  %2560 = vset.pattern.permute.xlu0 (!%p211_p10), %v2733_v3  ;;  %v290_v8 = vld [vmem:[%s3589_s2 + $0x8] sm:$0xff] (!%p211_p10)  ;;  %v292_v10 = vld [vmem:[%s3589_s2 + $0x18] sm:$0xff] (!%p211_p10)  ;;  %vm673_vm0 = vcmask (!%p211_p10), 1040384   ;;  %v293_v14 = vld [vmem:[%s3589_s2 + $0x20] sm:$0xff] (!%p211_p10)  ;;  %vm618_vm1 = vcmask (!%p211_p10), 15360  }
  0x10   : > { %v608_v5 = vshrl.u32 (!%p211_p10), %v607_v0, 7  ;;  %327 = vperm.xlu0 (!%p211_p10), %2560, %v289_v4   ;;  %2561 = vset.pattern.permute.xlu1 (!%p211_p10), %v2733_v3  ;;  %v294_v17 = vld [vmem:[%s3589_s2 + $0x28] sm:$0xff] (!%p211_p10)  ;;  %v2562_v18 = vld [vmem:[%s3588_s1] sm:$0xff] (!%p211_p10)   ;;  %v295_v19 = vld [vmem:[%s3589_s2 + $0x30] sm:$0xff] (!%p211_p10)  ;;  %vm1559_vm2 = vcmask (!%p211_p10), 261120   ;;  %s238_s15 = sand.u32 (!%p211_p10), 1, %s2714_s19  }
  0x11   : > { %v606_v6 = vunpack.c.0.s8 (!%p211_p10), %v605_v2  ;;  %337 = vperm.xlu1 (!%p211_p10), %2561, %v291_v7   ;;  %v296_v20 = vld [vmem:[%s3589_s2 + $0x38] sm:$0xff] (!%p211_p10)  ;;  %v297_v21 = vld [vmem:[%s3589_s2 + $0x40] sm:$0xff] (!%p211_p10)  ;;  %v298_v22 = vld [vmem:[%s3589_s2 + $0x48] sm:$0xff] (!%p211_p10)  ;;  %s2499_s16 = smul.u32 (!%p211_p10), 576, %s238_s15 }
  0x12   : > { %v2563_v23 = vld [vmem:[%s3588_s1 + $0x8] sm:$0xff] (!%p211_p10)   ;;  %v299_v24 = vld [vmem:[%s3589_s2 + $0x50] sm:$0xff] (!%p211_p10)  ;;  %v300_v25 = vld [vmem:[%s3589_s2 + $0x58] sm:$0xff] (!%p211_p10)  ;;  %s2500_s24 = smul.u32 (!%p211_p10), 9216, %s2722_s21 }
  0x13   : > { %v609_v9 = vsub.s32 (!%p211_p10), %v606_v6, %v608_v5  ;;  %v301_v26 = vld [vmem:[%s3589_s2 + $0x60] sm:$0xff] (!%p211_p10)  ;;  %v302_v27 = vld [vmem:[%s3589_s2 + $0x68] sm:$0xff] (!%p211_p10)  ;;  %v2564_v28 = vld [vmem:[%s3588_s1 + $0x10] sm:$0xff] (!%p211_p10)  }
  0x14   : > { %332 = vperm.xlu0 (!%p211_p10), %2560, %v290_v8   ;;  %v303_v29 = vld [vmem:[%s3589_s2 + $0x70] sm:$0xff] (!%p211_p10)  ;;  %v304_v30 = vld [vmem:[%s3589_s2 + $0x78] sm:$0xff] (!%p211_p10)  ;;  %v305_v31 = vld [vmem:[%s3589_s2 + $0x80] sm:$0xff] (!%p211_p10)  ;;  %s3532_s7 = scalar_lea.hbm (!%p211_p10), %s3592_s5, %s2500_s24 }
  0x15   : > { %342 = vperm.xlu1 (!%p211_p10), %2561, %v292_v10   ;;  %v306_v32 = vld [vmem:[%s3589_s2 + $0x88] sm:$0xff] (!%p211_p10)  ;;  %v2565_v33 = vld [vmem:[%s3588_s1 + $0x18] sm:$0xff] (!%p211_p10)   ;;  %v307_v34 = vld [vmem:[%s3589_s2 + $0x90] sm:$0xff] (!%p211_p10) }
  0x16   : > { %s243_s9 = scalar_select %p242_p11, %s2722_s21, 1  ;;  %v308_v35 = vld [vmem:[%s3589_s2 + $0x98] sm:$0xff]  ;;  %v309_v36 = vld [vmem:[%s3589_s2 + $0xa0] sm:$0xff]  ;;  %v310_v37 = vld [vmem:[%s3589_s2 + $0xa8] sm:$0xff] }
  0x17   : > { %v2566_v38 = vld [vmem:[%s3588_s1 + $0x20] sm:$0xff]   ;;  %v311_v39 = vld [vmem:[%s3589_s2 + $0xb0] sm:$0xff]  ;;  %v312_v40 = vld [vmem:[%s3589_s2 + $0xb8] sm:$0xff]  ;;  %s3541_s21 = scalar_lea.sflag [#allocation3], %s238_s15 }
  0x18   : > { %s2209_s14 = sshll.u32 %s243_s9, 1  ;;  %347 = vperm.xlu0 %2560, %v293_v14   ;;  %v313_v41 = vld [vmem:[%s3589_s2 + $0xc0] sm:$0xff]  ;;  %v314_v42 = vld [vmem:[%s3589_s2 + $0xc8] sm:$0xff]  ;;  %v315_v44 = vld [vmem:[%s3589_s2 + $0xd0] sm:$0xff]  ;;  %s2734_s9 = smov [#allocation2]  }
  0x19   : > { %s248_s17 = scalar_lea.vmem %s3587_s0, %s2209_s14  ;;  %352 = vperm.xlu1 %2561, %v294_v17   ;;  %v2567_v43 = vld [vmem:[%s3588_s1 + $0x28] sm:$0xff]   ;;  %v316_v45 = vld [vmem:[%s3589_s2 + $0xd8] sm:$0xff]  ;;  %v317_v46 = vld [vmem:[%s3589_s2 + $0xe0] sm:$0xff]  ;;  %s2656_s10 = sshll.u32 %s2734_s9, 4  ;;  %s2657_s10 = int_to_ptr.vmem [resolvable:$false] %s2656_s10 }
  0x1a   : > { %v2228_v11 = vld.sshfl [vmem:[%s248_s17] sm:$0x11 pattern:$0x75316420]  ;;  %v318_v47 = vld [vmem:[%s3589_s2 + $0xe8] sm:$0xff]  ;;  %v2568_v48 = vld [vmem:[%s3588_s1 + $0x30] sm:$0xff]  }
  0x1b   : > { %v603_v12 = vcombine.high %v2228_v11, %v2228_v11  ;;  %v610_v13 = vrot.slane %v2228_v11, %v609_v9  ;;  %v319_v49 = vld [vmem:[%s3589_s2 + $0xf0] sm:$0xff]  ;;  %v320_v50 = vld [vmem:[%s3589_s2 + $0xf8] sm:$0xff]  ;;  %v321_v51 = vld [vmem:[%s3589_s2 + $0x100] sm:$0xff]  ;;  %s3374_s17 = scalar_lea.vmem [#allocation2], %s2499_s16  ;;  %s2658_s11 = scalar_lea.vmem %s2657_s10, 18432 }
  0x1c   : > { %357 = vperm.xlu0 %2560, %v295_v19   ;;  %v322_v52 = vld [vmem:[%s3589_s2 + $0x108] sm:$0xff]  ;;  %v2569_v53 = vld [vmem:[%s3588_s1 + $0x38] sm:$0xff]   ;;  %v323_v54 = vld [vmem:[%s3589_s2 + $0x110] sm:$0xff]  ;;  %s2128_s25 = sshll.u32 %s3374_s17, 4  ;;  %s3534_s25 = int_to_ptr.vmem [resolvable:$true] %s2128_s25 }
  0x1d   : > { %v617_v15 = vrot.slane %v603_v12, %v609_v9  ;;  %v675_v16 = vsel %vm673_vm0, %v610_v13, 0  ;;  %362 = vperm.xlu1 %2561, %v296_v20   ;;  %v324_v55 = vld [vmem:[%s3589_s2 + $0x118] sm:$0xff]  ;;  %v1073_v56 = vld [vmem:[%s3591_s4] sm:$0xff]  ;;  %v1074_v57 = vld [vmem:[%s3591_s4 + $0x8] sm:$0xff]  ;;  %s2652_s8 = scalar_lea.vmem %s3534_s25, 9216  ;;  %p2659_p1 = scmp.lt.s32.totalorder %s3534_s25, %s2657_s10 }
  0x1e   : > { %v2570_v58 = vld [vmem:[%s3588_s1 + $0x40] sm:$0xff]   ;;  %v1075_v59 = vld [vmem:[%s3591_s4 + $0x10] sm:$0xff]  ;;  %v1076_v60 = vld [vmem:[%s3591_s4 + $0x18] sm:$0xff]  ;;  %p2653_p12 = scmp.ne.s32.totalorder %s3534_s25, %s2652_s8  ;;  %p2660_p2 = scmp.lt.s32.totalorder %s2658_s11, %s2652_s8 }
  0x1f   : > { %2229 = vmatprep.subr.msk.bf16.mxu0 %vm673_vm0, %v617_v15  ;;  %v1077_v61 = vld [vmem:[%s3591_s4 + $0x20] sm:$0xff]  ;;  %v1078_v62 = vld [vmem:[%s3591_s4 + $0x28] sm:$0xff]  ;;  %v1079_v0 = vld [vmem:[%s3591_s4 + $0x30] sm:$0xff] }
  0x20   : > { %681 = vmatpush1.bf16.msra.mxu0 %v675_v16  ;;  %367 = vperm.xlu0 %2560, %v297_v21   ;;  %v2571_v63 = vld [vmem:[%s3588_s1 + $0x48] sm:$0xff]   ;;  %v1080_v1 = vld [vmem:[%s3591_s4 + $0x38] sm:$0xff]  ;;  %v1081_v2 = vld [vmem:[%s3591_s4 + $0x40] sm:$0xff]  ;;  %p2654_p13 = pnand %p2653_p12, %p2807_p4  ;;  %p2661_p3 = por %p2660_p2, %p2659_p1 }
  0x21   : > { %372 = vperm.xlu1 %2561, %v298_v22   ;;  %v1082_v4 = vld [vmem:[%s3591_s4 + $0x48] sm:$0xff]  ;;  %v2572_v5 = vld [vmem:[%s3588_s1 + $0x50] sm:$0xff]   ;;  %v1084_v7 = vld [vmem:[%s3591_s4 + $0x58] sm:$0xff] }
  0x22   : > { %v1083_v6 = vld [vmem:[%s3591_s4 + $0x50] sm:$0xff]  ;;  %v1085_v8 = vld [vmem:[%s3591_s4 + $0x60] sm:$0xff]  ;;  %v1086_v9 = vld [vmem:[%s3591_s4 + $0x68] sm:$0xff]  ;;  %p2655_p0 = pneg %p2654_p13 }
  0x23   : > { %2230 = vmatmul.mubr.msk.bf16.vlgmr.msra.gmra.mrb[0].mxu0 %vm618_vm1, %v2562_v18  ;;  %v2573_v10 = vld [vmem:[%s3588_s1 + $0x58] sm:$0xff]   ;;  %v1087_v11 = vld [vmem:[%s3591_s4 + $0x70] sm:$0xff]  ;;  %v1089_v13 = vld [vmem:[%s3591_s4 + $0x80] sm:$0xff] }
  0x24   : > { %722 = vmatprep.mubr.bf16.mxu0 %v2733_v3  ;;  %377 = vperm.xlu0 %2560, %v299_v24   ;;  %v1088_v12 = vld [vmem:[%s3591_s4 + $0x78] sm:$0xff]  ;;  %v1090_v14 = vld [vmem:[%s3591_s4 + $0x88] sm:$0xff]  ;;  %v2574_v15 = vld [vmem:[%s3588_s1 + $0x60] sm:$0xff]   ;;  %p2662_p5 = pnand %p2661_p3, %p2655_p0 }
  0x25   : > { %382 = vperm.xlu1 %2561, %v300_v25   ;;  %v1091_v16 = vld [vmem:[%s3591_s4 + $0x90] sm:$0xff]  ;;  %v1092_v17 = vld [vmem:[%s3591_s4 + $0x98] sm:$0xff]  ;;  %v1093_v18 = vld [vmem:[%s3591_s4 + $0xa0] sm:$0xff] }
  0x26   : > { %v1094_v19 = vld [vmem:[%s3591_s4 + $0xa8] sm:$0xff]  ;;  %v1095_v21 = vld [vmem:[%s3591_s4 + $0xb0] sm:$0xff]  ;;  %v1096_v22 = vld [vmem:[%s3591_s4 + $0xb8] sm:$0xff] }
  0x27   : > { %v2575_v20 = vld [vmem:[%s3588_s1 + $0x68] sm:$0xff]   ;;  %v2576_v25 = vld [vmem:[%s3588_s1 + $0x70] sm:$0xff]  }
  0x28   : > { %387 = vperm.xlu0 %2560, %v301_v26   ;;  %v1098_v24 = vld [vmem:[%s3591_s4 + $0xc8] sm:$0xff]  ;;  %v1099_v26 = vld [vmem:[%s3591_s4 + $0xd0] sm:$0xff] }
  0x29   : > { %392 = vperm.xlu1 %2561, %v302_v27   ;;  %v1100_v27 = vld [vmem:[%s3591_s4 + $0xd8] sm:$0xff] }
  0x2b   : > { %2231 = vmatmul.mubr.msk.bf16.gmra.mrb[4].mxu0 %vm618_vm1, %v2563_v23  ;;  %v1097_v23 = vld [vmem:[%s3591_s4 + $0xc0] sm:$0xff] }
  0x2c   : > { %732 = vmatprep.mubr.bf16.mxu0 %v2733_v3  ;;  %397 = vperm.xlu0 %2560, %v303_v29   ;;  %v1102_v29 = vld [vmem:[%s3591_s4 + $0xe8] sm:$0xff] }
  0x2d   : > { %402 = vperm.xlu1 %2561, %v304_v30   ;;  %v2577_v30 = vld [vmem:[%s3588_s1 + $0x78] sm:$0xff]  }
  0x30   : > { %407 = vperm.xlu0 %2560, %v305_v31   ;;  %v1103_v31 = vld [vmem:[%s3591_s4 + $0xf0] sm:$0xff] }
  0x31   : > { %412 = vperm.xlu1 %2561, %v306_v32   ;;  %v1104_v32 = vld [vmem:[%s3591_s4 + $0xf8] sm:$0xff] }
  0x33   : > { %2232 = vmatmul.mubr.msk.bf16.gmra.mrb[8].mxu0 %vm618_vm1, %v2564_v28  ;;  %v1101_v28 = vld [vmem:[%s3591_s4 + $0xe0] sm:$0xff] }
  0x34   : > { %742 = vmatprep.mubr.bf16.mxu0 %v2733_v3  ;;  %417 = vperm.xlu0 %2560, %v307_v34   ;;  %v1106_v34 = vld [vmem:[%s3591_s4 + $0x108] sm:$0xff] }
  0x35   : > { %422 = vperm.xlu1 %2561, %v308_v35   ;;  %v2578_v35 = vld [vmem:[%s3588_s1 + $0x80] sm:$0xff]  }
  0x38   : > { %427 = vperm.xlu0 %2560, %v309_v36   ;;  %v1107_v36 = vld [vmem:[%s3591_s4 + $0x110] sm:$0xff] }
  0x39   : > { %432 = vperm.xlu1 %2561, %v310_v37   ;;  %v1108_v37 = vld [vmem:[%s3591_s4 + $0x118] sm:$0xff] }
  0x3b   : > { %2233 = vmatmul.mubr.msk.bf16.gmra.mrb[12].mxu0 %vm618_vm1, %v2565_v33  ;;  %v1105_v33 = vld [vmem:[%s3591_s4 + $0x100] sm:$0xff] }
  0x3c   : > { %752 = vmatprep.mubr.bf16.mxu0 %v2733_v3  ;;  %437 = vperm.xlu0 %2560, %v311_v39  }
  0x3d   : > { %442 = vperm.xlu1 %2561, %v312_v40  }
  0x40   : > { %447 = vperm.xlu0 %2560, %v313_v41  }
  0x41   : > { %452 = vperm.xlu1 %2561, %v314_v42  }
  0x43   : > { %2234 = vmatmul.mubr.msk.bf16.gmra.mrb[16].mxu0 %vm618_vm1, %v2566_v38  ;;  %v2579_v38 = vld [vmem:[%s3588_s1 + $0x88] sm:$0xff]  }
  0x44   : > { %762 = vmatprep.mubr.bf16.mxu0 %v2733_v3  ;;  %457 = vperm.xlu0 %2560, %v315_v44  }
  0x45   : > { %462 = vperm.xlu1 %2561, %v316_v45  }
  0x48   : > { %467 = vperm.xlu0 %2560, %v317_v46  }
  0x49   : > { %472 = vperm.xlu1 %2561, %v318_v47  }
  0x4b   : > { %2235 = vmatmul.mubr.msk.bf16.gmra.mrb[20].mxu0 %vm618_vm1, %v2567_v43 }
  0x4c   : > { %772 = vmatprep.mubr.bf16.mxu0 %v2733_v3  ;;  %477 = vperm.xlu0 %2560, %v319_v49   ;;  %v2585_v49 = vld [vmem:[%s3590_s3 + $0x124] ss:$12 sps:$4 sm:$0xff]  }
  0x4d   : > { %482 = vperm.xlu1 %2561, %v320_v50   ;;  %1766 = vmatprep.mubr.bf16.mxu1 %v2585_v49 }
  0x50   : > { %487 = vperm.xlu0 %2560, %v321_v51  }
  0x51   : > { %492 = vperm.xlu1 %2561, %v322_v52  }
  0x53   : > { %2236 = vmatmul.mubr.msk.bf16.gmra.mrb[24].mxu0 %vm618_vm1, %v2568_v48  ;;  %v2582_v48 = vld [vmem:[%s3590_s3 + $0x4] ss:$12 sps:$4 sm:$0xff]  }
  0x54   : > { %782 = vmatprep.mubr.bf16.mxu0 %v2733_v3  ;;  %497 = vperm.xlu0 %2560, %v323_v54  }
  0x55   : > { %502 = vperm.xlu1 %2561, %v324_v55  }
  0x58   : > { %1111 = vperm.xlu0 %2560, %v1073_v56  }
  0x59   : > { %1116 = vperm.xlu1 %2561, %v1074_v57  }
  0x5b   : > { %2237 = vmatmul.mubr.msk.bf16.gmra.mrb[28].mxu0 %vm618_vm1, %v2569_v53 }
  0x5c   : > { %792 = vmatprep.mubr.bf16.mxu0 %v2733_v3  ;;  %1121 = vperm.xlu0 %2560, %v1075_v59  }
  0x5d   : > { %1126 = vperm.xlu1 %2561, %v1076_v60  }
  0x60   : > { %1131 = vperm.xlu0 %2560, %v1077_v61  }
  0x61   : > { %1136 = vperm.xlu1 %2561, %v1078_v62  }
  0x63   : > { %2238 = vmatmul.mubr.msk.bf16.gmra.mrb[32].mxu0 %vm618_vm1, %v2570_v58 }
  0x64   : > { %802 = vmatprep.mubr.bf16.mxu0 %v2733_v3  ;;  %1141 = vperm.xlu0 %2560, %v1079_v0  }
  0x65   : > { %1146 = vperm.xlu1 %2561, %v1080_v1  }
  0x68   : > { %1151 = vperm.xlu0 %2560, %v1081_v2  }
  0x69   : > { %1156 = vperm.xlu1 %2561, %v1082_v4  }
  0x6b   : > { %2239 = vmatmul.mubr.msk.bf16.gmra.mrb[36].mxu0 %vm618_vm1, %v2571_v63 }
  0x6c   : > { %812 = vmatprep.mubr.bf16.mxu0 %v2733_v3  ;;  %1161 = vperm.xlu0 %2560, %v1083_v6  }
  0x6d   : > { %1166 = vperm.xlu1 %2561, %v1084_v7  }
  0x70   : > { %1171 = vperm.xlu0 %2560, %v1085_v8  }
  0x71   : > { %1176 = vperm.xlu1 %2561, %v1086_v9  }
  0x73   : > { %2240 = vmatmul.mubr.msk.bf16.gmra.mrb[40].mxu0 %vm618_vm1, %v2572_v5 }
  0x74   : > { %822 = vmatprep.mubr.bf16.mxu0 %v2733_v3  ;;  %1181 = vperm.xlu0 %2560, %v1087_v11  }
  0x75   : > { %1186 = vperm.xlu1 %2561, %v1088_v12  }
  0x78   : > { %1191 = vperm.xlu0 %2560, %v1089_v13  }
  0x79   : > { %1196 = vperm.xlu1 %2561, %v1090_v14  }
  0x7b   : > { %2241 = vmatmul.mubr.msk.bf16.gmra.mrb[44].mxu0 %vm618_vm1, %v2573_v10 }
  0x7c   : > { %832 = vmatprep.mubr.bf16.mxu0 %v2733_v3  ;;  %1201 = vperm.xlu0 %2560, %v1091_v16  }
  0x7d   : > { %1206 = vperm.xlu1 %2561, %v1092_v17  }
  0x80   : > { %1211 = vperm.xlu0 %2560, %v1093_v18  }
  0x81   : > { %1216 = vperm.xlu1 %2561, %v1094_v19  }
  0x83   : > { %2242 = vmatmul.mubr.msk.bf16.gmra.mrb[48].mxu0 %vm618_vm1, %v2574_v15 }
  0x84   : > { %842 = vmatprep.mubr.bf16.mxu0 %v2733_v3  ;;  %1221 = vperm.xlu0 %2560, %v1095_v21  }
  0x85   : > { %1226 = vperm.xlu1 %2561, %v1096_v22  }
  0x88   : > { %1231 = vperm.xlu0 %2560, %v1097_v23  }
  0x89   : > { %1236 = vperm.xlu1 %2561, %v1098_v24  }
  0x8b   : > { %2243 = vmatmul.mubr.msk.bf16.gmra.mrb[52].mxu0 %vm618_vm1, %v2575_v20 }
  0x8c   : > { %852 = vmatprep.mubr.bf16.mxu0 %v2733_v3  ;;  %1241 = vperm.xlu0 %2560, %v1099_v26  }
  0x8d   : > { %1246 = vperm.xlu1 %2561, %v1100_v27  }
  0x8f   : > { %v328_v39 = vpop.permute.xlu0 %327 }
  0x90   : > { %1251 = vperm.xlu0 %2560, %v1101_v28   ;;  %v338_v50 = vpop.permute.xlu1 %337 }
  0x91   : > { %1256 = vperm.xlu1 %2561, %v1102_v29  }
  0x93   : > { %2244 = vmatmul.mubr.msk.bf16.gmra.mrb[56].mxu0 %vm618_vm1, %v2576_v25  ;;  %v333_v43 = vpop.permute.xlu0 %332 }
  0x94   : > { %862 = vmatprep.mubr.bf16.mxu0 %v2733_v3  ;;  %1261 = vperm.xlu0 %2560, %v1103_v31   ;;  %v343_v61 = vpop.permute.xlu1 %342 }
  0x95   : > { %1266 = vperm.xlu1 %2561, %v1104_v32  }
  0x97   : > { %v348_v9 = vpop.permute.xlu0 %347 }
  0x98   : > { %1271 = vperm.xlu0 %2560, %v1105_v33   ;;  %v353_v14 = vpop.permute.xlu1 %352 }
  0x99   : > { %1276 = vperm.xlu1 %2561, %v1106_v34  }
  0x9b   : > { %2245 = vmatmul.mubr.msk.bf16.gmra.mrb[60].mxu0 %vm618_vm1, %v2577_v30  ;;  %v358_v25 = vpop.permute.xlu0 %357 }
  0x9c   : > { %872 = vmatprep.mubr.bf16.mxu0 %v2733_v3  ;;  %1281 = vperm.xlu0 %2560, %v1107_v36   ;;  %v363_v30 = vpop.permute.xlu1 %362 }
  0x9d   : > { %1286 = vperm.xlu1 %2561, %v1108_v37  }
  0xa3   : > { %2246 = vmatmul.mubr.msk.bf16.gmra.mrb[64].mxu0 %vm618_vm1, %v2578_v35 }
  0xa4   : > { %882 = vmatprep.mubr.bf16.mxu0 %v2733_v3 }
  0xab   : > { %2247 = vmatmul.mubr.msk.bf16.gmra.mrb[68].mxu0 %vm618_vm1, %v2579_v38 }
  0xac   : > { %1646 = vmatprep.mubr.bf16.mxu0 %v2582_v48 }
  0xf6   : > { %v714_v40 = vpop.f32.mrb[0].mxu0 }
  0xf7   : > { %v715_v41 = vadd.f32 %v714_v40, %v328_v39  ;;  %v716_v42 = vpop.f32.mrb[1].mxu0 }
  0xf8   : > { %v717_v44 = vadd.f32 %v716_v42, %v328_v39  ;;  %v718_v45 = vpop.f32.mrb[2].mxu0 }
  0xf9   : > { %v719_v46 = vadd.f32 %v718_v45, %v333_v43  ;;  %v720_v47 = vpop.f32.mrb[3].mxu0  ;;  %v893_v52 = vmax.f32 %v715_v41, 0.0  ;;  %v368_v41 = vpop.permute.xlu0 %367 }
  0xfa   : > { %v721_v51 = vadd.f32 %v720_v47, %v333_v43  ;;  %v894_v54 = vmax.f32 %v717_v44, 0.0 }
  0xfb   : > { %v895_v53 = vmax.f32 %v719_v46, 0.0  ;;  %v373_v46 = vpop.permute.xlu1 %372 }
  0xfc   : > { %v896_v55 = vmax.f32 %v721_v51, 0.0 }
  0xfd   : > { %v1037_v56 = vpack.c.bf16 %v895_v53, %v893_v52 }
  0xfe   : > { %v1038_v57 = vpack.c.bf16 %v896_v55, %v894_v54  ;;  %v724_v58 = vpop.f32.mrb[4].mxu0 }
  0xff   : > { %v725_v59 = vadd.f32 %v724_v58, %v338_v50  ;;  %v726_v60 = vpop.f32.mrb[5].mxu0 }
 0x100   : > { %v727_v62 = vadd.f32 %v726_v60, %v338_v50  ;;  %v728_v63 = vpop.f32.mrb[6].mxu0  ;;  %1614 = vmatprep.subr.bf16.mxu0 %v1038_v57  ;;  %2323 = vmatprep.subr.bf16.mxu1 %v1038_v57  ;;  %v378_v57 = vpop.permute.xlu0 %377 }
 0x101   : > { %v729_v0 = vadd.f32 %v728_v63, %v343_v61  ;;  %v730_v1 = vpop.f32.mrb[7].mxu0  ;;  %1615 = vmatpush1.bf16.msra.mxu0 %v1037_v56  ;;  %2339 = vmatpush1.bf16.msra.mxu1 %v1037_v56  ;;  %v897_v4 = vmax.f32 %v725_v59, 0.0 }
 0x102   : > { %v731_v2 = vadd.f32 %v730_v1, %v343_v61  ;;  %v898_v6 = vmax.f32 %v727_v62, 0.0  ;;  %v383_v62 = vpop.permute.xlu1 %382 }
 0x103   : > { %v899_v5 = vmax.f32 %v729_v0, 0.0 }
 0x104   : > { %v900_v7 = vmax.f32 %v731_v2, 0.0 }
 0x105   : > { %v1039_v8 = vpack.c.bf16 %v899_v5, %v897_v4 }
 0x106   : > { %v1040_v10 = vpack.c.bf16 %v900_v7, %v898_v6  ;;  %v734_v11 = vpop.f32.mrb[8].mxu0 }
 0x107   : > { %v735_v12 = vadd.f32 %v734_v11, %v348_v9  ;;  %v736_v13 = vpop.f32.mrb[9].mxu0 }
 0x108   : > { %v737_v15 = vadd.f32 %v736_v13, %v348_v9  ;;  %v738_v16 = vpop.f32.mrb[10].mxu0  ;;  %1616 = vmatprep.subr.bf16.mxu0 %v1040_v10  ;;  %2324 = vmatprep.subr.bf16.mxu1 %v1040_v10  ;;  %v388_v10 = vpop.permute.xlu0 %387 }
 0x109   : > { %v739_v17 = vadd.f32 %v738_v16, %v353_v14  ;;  %v740_v18 = vpop.f32.mrb[11].mxu0  ;;  %1617 = vmatpush1.bf16.msra.mxu0 %v1039_v8  ;;  %2340 = vmatpush1.bf16.msra.mxu1 %v1039_v8  ;;  %v901_v20 = vmax.f32 %v735_v12, 0.0 }
 0x10a   : > { %v741_v19 = vadd.f32 %v740_v18, %v353_v14  ;;  %v902_v22 = vmax.f32 %v737_v15, 0.0  ;;  %v393_v15 = vpop.permute.xlu1 %392 }
 0x10b   : > { %v903_v21 = vmax.f32 %v739_v17, 0.0 }
 0x10c   : > { %v904_v23 = vmax.f32 %v741_v19, 0.0 }
 0x10d   : > { %v1041_v24 = vpack.c.bf16 %v903_v21, %v901_v20 }
 0x10e   : > { %v1042_v26 = vpack.c.bf16 %v904_v23, %v902_v22  ;;  %v744_v27 = vpop.f32.mrb[12].mxu0 }
 0x10f   : > { %v745_v28 = vadd.f32 %v744_v27, %v358_v25  ;;  %v746_v29 = vpop.f32.mrb[13].mxu0 }
 0x110   : > { %v747_v31 = vadd.f32 %v746_v29, %v358_v25  ;;  %v748_v32 = vpop.f32.mrb[14].mxu0  ;;  %1618 = vmatprep.subr.bf16.mxu0 %v1042_v26  ;;  %2325 = vmatprep.subr.bf16.mxu1 %v1042_v26  ;;  %v398_v26 = vpop.permute.xlu0 %397 }
 0x111   : > { %v749_v33 = vadd.f32 %v748_v32, %v363_v30  ;;  %v750_v34 = vpop.f32.mrb[15].mxu0  ;;  %1619 = vmatpush1.bf16.msra.mxu0 %v1041_v24  ;;  %2341 = vmatpush1.bf16.msra.mxu1 %v1041_v24  ;;  %v905_v36 = vmax.f32 %v745_v28, 0.0 }
 0x112   : > { %v751_v35 = vadd.f32 %v750_v34, %v363_v30  ;;  %v906_v38 = vmax.f32 %v747_v31, 0.0  ;;  %v403_v31 = vpop.permute.xlu1 %402 }
 0x113   : > { %v907_v37 = vmax.f32 %v749_v33, 0.0 }
 0x114   : > { %v908_v39 = vmax.f32 %v751_v35, 0.0 }
 0x115   : > { %v1043_v40 = vpack.c.bf16 %v907_v37, %v905_v36 }
 0x116   : > { %v1044_v42 = vpack.c.bf16 %v908_v39, %v906_v38  ;;  %v754_v43 = vpop.f32.mrb[16].mxu0 }
 0x117   : > { %v755_v44 = vadd.f32 %v754_v43, %v368_v41  ;;  %v756_v45 = vpop.f32.mrb[17].mxu0 }
 0x118   : > { %v757_v47 = vadd.f32 %v756_v45, %v368_v41  ;;  %v758_v48 = vpop.f32.mrb[18].mxu0  ;;  %1620 = vmatprep.subr.bf16.mxu0 %v1044_v42  ;;  %2326 = vmatprep.subr.bf16.mxu1 %v1044_v42  ;;  %v408_v42 = vpop.permute.xlu0 %407 }
 0x119   : > { %v759_v49 = vadd.f32 %v758_v48, %v373_v46  ;;  %v760_v50 = vpop.f32.mrb[19].mxu0  ;;  %1621 = vmatpush1.bf16.msra.mxu0 %v1043_v40  ;;  %2342 = vmatpush1.bf16.msra.mxu1 %v1043_v40  ;;  %v909_v52 = vmax.f32 %v755_v44, 0.0 }
 0x11a   : > { %v761_v51 = vadd.f32 %v760_v50, %v373_v46  ;;  %v910_v54 = vmax.f32 %v757_v47, 0.0  ;;  %v413_v47 = vpop.permute.xlu1 %412 }
 0x11b   : > { %v911_v53 = vmax.f32 %v759_v49, 0.0 }
 0x11c   : > { %v912_v55 = vmax.f32 %v761_v51, 0.0 }
 0x11d   : > { %v1045_v56 = vpack.c.bf16 %v911_v53, %v909_v52 }
 0x11e   : > { %v1046_v58 = vpack.c.bf16 %v912_v55, %v910_v54  ;;  %v764_v59 = vpop.f32.mrb[20].mxu0 }
 0x11f   : > { %v765_v60 = vadd.f32 %v764_v59, %v378_v57  ;;  %v766_v61 = vpop.f32.mrb[21].mxu0 }
 0x120   : > { %v767_v63 = vadd.f32 %v766_v61, %v378_v57  ;;  %v768_v0 = vpop.f32.mrb[22].mxu0  ;;  %1622 = vmatprep.subr.bf16.mxu0 %v1046_v58  ;;  %2327 = vmatprep.subr.bf16.mxu1 %v1046_v58  ;;  %v418_v58 = vpop.permute.xlu0 %417 }
 0x121   : > { %v769_v1 = vadd.f32 %v768_v0, %v383_v62  ;;  %v770_v2 = vpop.f32.mrb[23].mxu0  ;;  %1623 = vmatpush1.bf16.msra.mxu0 %v1045_v56  ;;  %2343 = vmatpush1.bf16.msra.mxu1 %v1045_v56  ;;  %v913_v5 = vmax.f32 %v765_v60, 0.0 }
 0x122   : > { %v771_v4 = vadd.f32 %v770_v2, %v383_v62  ;;  %v914_v7 = vmax.f32 %v767_v63, 0.0  ;;  %v423_v63 = vpop.permute.xlu1 %422 }
 0x123   : > { %v915_v6 = vmax.f32 %v769_v1, 0.0 }
 0x124   : > { %v916_v8 = vmax.f32 %v771_v4, 0.0 }
 0x125   : > { %v1047_v9 = vpack.c.bf16 %v915_v6, %v913_v5 }
 0x126   : > { %v1048_v11 = vpack.c.bf16 %v916_v8, %v914_v7  ;;  %v774_v12 = vpop.f32.mrb[24].mxu0 }
 0x127   : > { %v775_v13 = vadd.f32 %v774_v12, %v388_v10  ;;  %v776_v14 = vpop.f32.mrb[25].mxu0 }
 0x128   : > { %v777_v16 = vadd.f32 %v776_v14, %v388_v10  ;;  %v778_v17 = vpop.f32.mrb[26].mxu0  ;;  %1624 = vmatprep.subr.bf16.mxu0 %v1048_v11  ;;  %2328 = vmatprep.subr.bf16.mxu1 %v1048_v11  ;;  %v428_v11 = vpop.permute.xlu0 %427 }
 0x129   : > { %v779_v18 = vadd.f32 %v778_v17, %v393_v15  ;;  %v780_v19 = vpop.f32.mrb[27].mxu0  ;;  %1625 = vmatpush1.bf16.msra.mxu0 %v1047_v9  ;;  %2344 = vmatpush1.bf16.msra.mxu1 %v1047_v9  ;;  %v917_v21 = vmax.f32 %v775_v13, 0.0 }
 0x12a   : > { %v781_v20 = vadd.f32 %v780_v19, %v393_v15  ;;  %v918_v23 = vmax.f32 %v777_v16, 0.0  ;;  %v433_v16 = vpop.permute.xlu1 %432 }
 0x12b   : > { %v919_v22 = vmax.f32 %v779_v18, 0.0 }
 0x12c   : > { %v920_v24 = vmax.f32 %v781_v20, 0.0 }
 0x12d   : > { %v1049_v25 = vpack.c.bf16 %v919_v22, %v917_v21 }
 0x12e   : > { %v1050_v27 = vpack.c.bf16 %v920_v24, %v918_v23  ;;  %v784_v28 = vpop.f32.mrb[28].mxu0 }
 0x12f   : > { %v785_v29 = vadd.f32 %v784_v28, %v398_v26  ;;  %v786_v30 = vpop.f32.mrb[29].mxu0 }
 0x130   : > { %v787_v32 = vadd.f32 %v786_v30, %v398_v26  ;;  %v788_v33 = vpop.f32.mrb[30].mxu0  ;;  %1626 = vmatprep.subr.bf16.mxu0 %v1050_v27  ;;  %2329 = vmatprep.subr.bf16.mxu1 %v1050_v27  ;;  %v438_v27 = vpop.permute.xlu0 %437 }
 0x131   : > { %v789_v34 = vadd.f32 %v788_v33, %v403_v31  ;;  %v790_v35 = vpop.f32.mrb[31].mxu0  ;;  %1627 = vmatpush1.bf16.msra.mxu0 %v1049_v25  ;;  %2345 = vmatpush1.bf16.msra.mxu1 %v1049_v25  ;;  %v921_v37 = vmax.f32 %v785_v29, 0.0 }
 0x132   : > { %v791_v36 = vadd.f32 %v790_v35, %v403_v31  ;;  %v922_v39 = vmax.f32 %v787_v32, 0.0  ;;  %v443_v32 = vpop.permute.xlu1 %442 }
 0x133   : > { %v923_v38 = vmax.f32 %v789_v34, 0.0 }
 0x134   : > { %v924_v40 = vmax.f32 %v791_v36, 0.0 }
 0x135   : > { %v1051_v41 = vpack.c.bf16 %v923_v38, %v921_v37 }
 0x136   : > { %v1052_v43 = vpack.c.bf16 %v924_v40, %v922_v39  ;;  %v794_v44 = vpop.f32.mrb[32].mxu0 }
 0x137   : > { %v795_v45 = vadd.f32 %v794_v44, %v408_v42  ;;  %v796_v46 = vpop.f32.mrb[33].mxu0 }
 0x138   : > { %v797_v48 = vadd.f32 %v796_v46, %v408_v42  ;;  %v798_v49 = vpop.f32.mrb[34].mxu0  ;;  %1628 = vmatprep.subr.bf16.mxu0 %v1052_v43  ;;  %2330 = vmatprep.subr.bf16.mxu1 %v1052_v43  ;;  %v448_v43 = vpop.permute.xlu0 %447 }
 0x139   : > { %v799_v50 = vadd.f32 %v798_v49, %v413_v47  ;;  %v800_v51 = vpop.f32.mrb[35].mxu0  ;;  %1629 = vmatpush1.bf16.msra.mxu0 %v1051_v41  ;;  %2346 = vmatpush1.bf16.msra.mxu1 %v1051_v41  ;;  %v925_v53 = vmax.f32 %v795_v45, 0.0 }
 0x13a   : > { %v801_v52 = vadd.f32 %v800_v51, %v413_v47  ;;  %v926_v55 = vmax.f32 %v797_v48, 0.0  ;;  %v453_v48 = vpop.permute.xlu1 %452 }
 0x13b   : > { %v927_v54 = vmax.f32 %v799_v50, 0.0 }
 0x13c   : > { %v928_v56 = vmax.f32 %v801_v52, 0.0 }
 0x13d   : > { %v1053_v57 = vpack.c.bf16 %v927_v54, %v925_v53 }
 0x13e   : > { %v1054_v59 = vpack.c.bf16 %v928_v56, %v926_v55  ;;  %v804_v60 = vpop.f32.mrb[36].mxu0 }
 0x13f   : > { %v805_v61 = vadd.f32 %v804_v60, %v418_v58  ;;  %v806_v62 = vpop.f32.mrb[37].mxu0 }
 0x140   : > { %v807_v0 = vadd.f32 %v806_v62, %v418_v58  ;;  %v808_v1 = vpop.f32.mrb[38].mxu0  ;;  %1630 = vmatprep.subr.bf16.mxu0 %v1054_v59  ;;  %2331 = vmatprep.subr.bf16.mxu1 %v1054_v59  ;;  %v458_v59 = vpop.permute.xlu0 %457 }
 0x141   : > { %v809_v2 = vadd.f32 %v808_v1, %v423_v63  ;;  %v810_v4 = vpop.f32.mrb[39].mxu0  ;;  %1631 = vmatpush1.bf16.msra.mxu0 %v1053_v57  ;;  %2347 = vmatpush1.bf16.msra.mxu1 %v1053_v57  ;;  %v929_v6 = vmax.f32 %v805_v61, 0.0 }
 0x142   : > { %v811_v5 = vadd.f32 %v810_v4, %v423_v63  ;;  %v930_v8 = vmax.f32 %v807_v0, 0.0  ;;  %v463_v0 = vpop.permute.xlu1 %462 }
 0x143   : > { %v931_v7 = vmax.f32 %v809_v2, 0.0 }
 0x144   : > { %v932_v9 = vmax.f32 %v811_v5, 0.0 }
 0x145   : > { %v1055_v10 = vpack.c.bf16 %v931_v7, %v929_v6 }
 0x146   : > { %v1056_v12 = vpack.c.bf16 %v932_v9, %v930_v8  ;;  %v814_v13 = vpop.f32.mrb[40].mxu0 }
 0x147   : > { %v815_v14 = vadd.f32 %v814_v13, %v428_v11  ;;  %v816_v15 = vpop.f32.mrb[41].mxu0 }
 0x148   : > { %v817_v17 = vadd.f32 %v816_v15, %v428_v11  ;;  %v818_v18 = vpop.f32.mrb[42].mxu0  ;;  %1632 = vmatprep.subr.bf16.mxu0 %v1056_v12  ;;  %2332 = vmatprep.subr.bf16.mxu1 %v1056_v12  ;;  %v468_v12 = vpop.permute.xlu0 %467 }
 0x149   : > { %v819_v19 = vadd.f32 %v818_v18, %v433_v16  ;;  %v820_v20 = vpop.f32.mrb[43].mxu0  ;;  %1633 = vmatpush1.bf16.msra.mxu0 %v1055_v10  ;;  %2348 = vmatpush1.bf16.msra.mxu1 %v1055_v10  ;;  %v933_v22 = vmax.f32 %v815_v14, 0.0 }
 0x14a   : > { %v821_v21 = vadd.f32 %v820_v20, %v433_v16  ;;  %v934_v24 = vmax.f32 %v817_v17, 0.0  ;;  %v473_v17 = vpop.permute.xlu1 %472 }
 0x14b   : > { %v935_v23 = vmax.f32 %v819_v19, 0.0 }
 0x14c   : > { %v936_v25 = vmax.f32 %v821_v21, 0.0 }
 0x14d   : > { %v1057_v26 = vpack.c.bf16 %v935_v23, %v933_v22 }
 0x14e   : > { %v1058_v28 = vpack.c.bf16 %v936_v25, %v934_v24  ;;  %v824_v29 = vpop.f32.mrb[44].mxu0 }
 0x14f   : > { %v825_v30 = vadd.f32 %v824_v29, %v438_v27  ;;  %v826_v31 = vpop.f32.mrb[45].mxu0 }
 0x150   : > { %v827_v33 = vadd.f32 %v826_v31, %v438_v27  ;;  %v828_v34 = vpop.f32.mrb[46].mxu0  ;;  %1634 = vmatprep.subr.bf16.mxu0 %v1058_v28  ;;  %2333 = vmatprep.subr.bf16.mxu1 %v1058_v28  ;;  %v478_v28 = vpop.permute.xlu0 %477 }
 0x151   : > { %v829_v35 = vadd.f32 %v828_v34, %v443_v32  ;;  %v830_v36 = vpop.f32.mrb[47].mxu0  ;;  %1635 = vmatpush1.bf16.msra.mxu0 %v1057_v26  ;;  %2349 = vmatpush1.bf16.msra.mxu1 %v1057_v26  ;;  %v937_v38 = vmax.f32 %v825_v30, 0.0 }
 0x152   : > { %v831_v37 = vadd.f32 %v830_v36, %v443_v32  ;;  %v938_v40 = vmax.f32 %v827_v33, 0.0  ;;  %v483_v33 = vpop.permute.xlu1 %482 }
 0x153   : > { %v939_v39 = vmax.f32 %v829_v35, 0.0 }
 0x154   : > { %v940_v41 = vmax.f32 %v831_v37, 0.0 }
 0x155   : > { %v1059_v42 = vpack.c.bf16 %v939_v39, %v937_v38 }
 0x156   : > { %v1060_v44 = vpack.c.bf16 %v940_v41, %v938_v40  ;;  %v834_v45 = vpop.f32.mrb[48].mxu0 }
 0x157   : > { %v835_v46 = vadd.f32 %v834_v45, %v448_v43  ;;  %v836_v47 = vpop.f32.mrb[49].mxu0 }
 0x158   : > { %v837_v49 = vadd.f32 %v836_v47, %v448_v43  ;;  %v838_v50 = vpop.f32.mrb[50].mxu0  ;;  %1636 = vmatprep.subr.bf16.mxu0 %v1060_v44  ;;  %2334 = vmatprep.subr.bf16.mxu1 %v1060_v44  ;;  %v488_v44 = vpop.permute.xlu0 %487 }
 0x159   : > { %v839_v51 = vadd.f32 %v838_v50, %v453_v48  ;;  %v840_v52 = vpop.f32.mrb[51].mxu0  ;;  %1637 = vmatpush1.bf16.msra.mxu0 %v1059_v42  ;;  %2350 = vmatpush1.bf16.msra.mxu1 %v1059_v42  ;;  %v941_v54 = vmax.f32 %v835_v46, 0.0 }
 0x15a   : > { %v841_v53 = vadd.f32 %v840_v52, %v453_v48  ;;  %v942_v56 = vmax.f32 %v837_v49, 0.0  ;;  %v493_v49 = vpop.permute.xlu1 %492  ;;  %v2580_v52 = vld [vmem:[%s3590_s3] ss:$12 sps:$4 sm:$0xff]  }
 0x15b   : > { %v943_v55 = vmax.f32 %v839_v51, 0.0 }
 0x15c   : > { %v944_v57 = vmax.f32 %v841_v53, 0.0  ;;  %v2583_v53 = vld [vmem:[%s3590_s3 + $0x120] ss:$12 sps:$4 sm:$0xff]  }
 0x15d   : > { %v1061_v58 = vpack.c.bf16 %v943_v55, %v941_v54 }
 0x15e   : > { %v1062_v60 = vpack.c.bf16 %v944_v57, %v942_v56  ;;  %v844_v61 = vpop.f32.mrb[52].mxu0  ;;  %v2586_v56 = vld [vmem:[%s3590_s3 + $0x1c] ss:$12 sps:$4 sm:$0xff]  }
 0x15f   : > { %v845_v62 = vadd.f32 %v844_v61, %v458_v59  ;;  %v846_v63 = vpop.f32.mrb[53].mxu0  ;;  %v2588_v57 = vld [vmem:[%s3590_s3 + $0x13c] ss:$12 sps:$4 sm:$0xff]  }
 0x160   : > { %v847_v1 = vadd.f32 %v846_v63, %v458_v59  ;;  %v848_v2 = vpop.f32.mrb[54].mxu0  ;;  %1638 = vmatprep.subr.bf16.mxu0 %v1062_v60  ;;  %2335 = vmatprep.subr.bf16.mxu1 %v1062_v60 }
 0x161   : > { %v849_v4 = vadd.f32 %v848_v2, %v463_v0  ;;  %v850_v5 = vpop.f32.mrb[55].mxu0  ;;  %1639 = vmatpush1.bf16.msra.mxu0 %v1061_v58  ;;  %2351 = vmatpush1.bf16.msra.mxu1 %v1061_v58  ;;  %v945_v7 = vmax.f32 %v845_v62, 0.0 }
 0x162   : > { %v851_v6 = vadd.f32 %v850_v5, %v463_v0  ;;  %v946_v9 = vmax.f32 %v847_v1, 0.0  ;;  %v498_v0 = vpop.permute.xlu0 %497 }
 0x163   : > { %v947_v8 = vmax.f32 %v849_v4, 0.0 }
 0x164   : > { %v948_v10 = vmax.f32 %v851_v6, 0.0  ;;  %v503_v6 = vpop.permute.xlu1 %502 }
 0x165   : > { %v1063_v11 = vpack.c.bf16 %v947_v8, %v945_v7 }
 0x166   : > { %v1064_v13 = vpack.c.bf16 %v948_v10, %v946_v9  ;;  %v854_v14 = vpop.f32.mrb[56].mxu0  ;;  %v2590_v9 = vld [vmem:[%s3590_s3 + $0x18] ss:$12 sps:$4 sm:$0xff]  }
 0x167   : > { %v855_v15 = vadd.f32 %v854_v14, %v468_v12  ;;  %v856_v16 = vpop.f32.mrb[57].mxu0  ;;  %v2591_v10 = vld [vmem:[%s3590_s3 + $0x138] ss:$12 sps:$4 sm:$0xff]   ;;  %v2594_v14 = vld [vmem:[%s3590_s3 + $0x154] ss:$12 sps:$4 sm:$0xff]  }
 0x168   : > { %v857_v18 = vadd.f32 %v856_v16, %v468_v12  ;;  %v858_v19 = vpop.f32.mrb[58].mxu0  ;;  %1640 = vmatprep.subr.bf16.mxu0 %v1064_v13  ;;  %2336 = vmatprep.subr.bf16.mxu1 %v1064_v13  ;;  %v2592_v13 = vld [vmem:[%s3590_s3 + $0x34] ss:$12 sps:$4 sm:$0xff]  }
 0x169   : > { %v859_v20 = vadd.f32 %v858_v19, %v473_v17  ;;  %v860_v21 = vpop.f32.mrb[59].mxu0  ;;  %1641 = vmatpush1.bf16.msra.mxu0 %v1063_v11  ;;  %2352 = vmatpush1.bf16.msra.mxu1 %v1063_v11  ;;  %v949_v23 = vmax.f32 %v855_v15, 0.0 }
 0x16a   : > { %v861_v22 = vadd.f32 %v860_v21, %v473_v17  ;;  %v950_v25 = vmax.f32 %v857_v18, 0.0 }
 0x16b   : > { %v951_v24 = vmax.f32 %v859_v20, 0.0 }
 0x16c   : > { %v952_v26 = vmax.f32 %v861_v22, 0.0  ;;  %v2596_v22 = vld [vmem:[%s3590_s3 + $0x30] ss:$12 sps:$4 sm:$0xff]  }
 0x16d   : > { %v1065_v27 = vpack.c.bf16 %v951_v24, %v949_v23  ;;  %v2597_v23 = vld [vmem:[%s3590_s3 + $0x150] ss:$12 sps:$4 sm:$0xff]   ;;  %v2598_v24 = vld [vmem:[%s3590_s3 + $0x4c] ss:$12 sps:$4 sm:$0xff]  }
 0x16e   : > { %v1066_v29 = vpack.c.bf16 %v952_v26, %v950_v25  ;;  %v864_v30 = vpop.f32.mrb[60].mxu0  ;;  %v2600_v25 = vld [vmem:[%s3590_s3 + $0x16c] ss:$12 sps:$4 sm:$0xff]   ;;  %v2602_v26 = vld [vmem:[%s3590_s3 + $0x48] ss:$12 sps:$4 sm:$0xff]  }
 0x16f   : > { %v865_v31 = vadd.f32 %v864_v30, %v478_v28  ;;  %v866_v32 = vpop.f32.mrb[61].mxu0  ;;  %v2608_v30 = vld [vmem:[%s3590_s3 + $0x60] ss:$12 sps:$4 sm:$0xff]  }
 0x170   : > { %v867_v34 = vadd.f32 %v866_v32, %v478_v28  ;;  %v868_v35 = vpop.f32.mrb[62].mxu0  ;;  %1642 = vmatprep.subr.bf16.mxu0 %v1066_v29  ;;  %2337 = vmatprep.subr.bf16.mxu1 %v1066_v29  ;;  %v2604_v28 = vld [vmem:[%s3590_s3 + $0x64] ss:$12 sps:$4 sm:$0xff]   ;;  %v2610_v32 = vld [vmem:[%s3590_s3 + $0x7c] ss:$12 sps:$4 sm:$0xff]  }
 0x171   : > { %v869_v36 = vadd.f32 %v868_v35, %v483_v33  ;;  %v870_v37 = vpop.f32.mrb[63].mxu0  ;;  %1643 = vmatpush1.bf16.msra.mxu0 %v1065_v27  ;;  %2353 = vmatpush1.bf16.msra.mxu1 %v1065_v27  ;;  %v953_v39 = vmax.f32 %v865_v31, 0.0  ;;  %v2603_v27 = vld [vmem:[%s3590_s3 + $0x168] ss:$12 sps:$4 sm:$0xff]   ;;  %v2606_v29 = vld [vmem:[%s3590_s3 + $0x184] ss:$12 sps:$4 sm:$0xff]  }
 0x172   : > { %v871_v38 = vadd.f32 %v870_v37, %v483_v33  ;;  %v954_v41 = vmax.f32 %v867_v34, 0.0  ;;  %v2609_v31 = vld [vmem:[%s3590_s3 + $0x180] ss:$12 sps:$4 sm:$0xff]   ;;  %v2612_v33 = vld [vmem:[%s3590_s3 + $0x19c] ss:$12 sps:$4 sm:$0xff]  }
 0x173   : > { %v955_v40 = vmax.f32 %v869_v36, 0.0  ;;  %v2614_v34 = vld [vmem:[%s3590_s3 + $0x78] ss:$12 sps:$4 sm:$0xff]   ;;  %v2616_v36 = vld [vmem:[%s3590_s3 + $0x94] ss:$12 sps:$4 sm:$0xff]  }
 0x174   : > { %v956_v42 = vmax.f32 %v871_v38, 0.0  ;;  %v2615_v35 = vld [vmem:[%s3590_s3 + $0x198] ss:$12 sps:$4 sm:$0xff]   ;;  %v2618_v37 = vld [vmem:[%s3590_s3 + $0x90] ss:$12 sps:$4 sm:$0xff]  }
 0x175   : > { %v1067_v43 = vpack.c.bf16 %v955_v40, %v953_v39  ;;  %v2619_v38 = vld [vmem:[%s3590_s3 + $0x8] ss:$12 sps:$4 sm:$0xff]   ;;  %v2620_v39 = vld [vmem:[%s3590_s3 + $0xac] ss:$12 sps:$4 sm:$0xff]  }
 0x176   : > { %v1068_v45 = vpack.c.bf16 %v956_v42, %v954_v41  ;;  %v874_v46 = vpop.f32.mrb[64].mxu0  ;;  %v2622_v40 = vld [vmem:[%s3590_s3 + $0xa8] ss:$12 sps:$4 sm:$0xff]   ;;  %v2623_v41 = vld [vmem:[%s3590_s3 + $0x20] ss:$12 sps:$4 sm:$0xff]  }
 0x177   : > { %v875_v47 = vadd.f32 %v874_v46, %v488_v44  ;;  %v876_v48 = vpop.f32.mrb[65].mxu0  ;;  %v2624_v42 = vld [vmem:[%s3590_s3 + $0xc4] ss:$12 sps:$4 sm:$0xff]  }
 0x178   : > { %v877_v50 = vadd.f32 %v876_v48, %v488_v44  ;;  %v878_v51 = vpop.f32.mrb[66].mxu0  ;;  %1644 = vmatprep.subr.bf16.mxu0 %v1068_v45  ;;  %2338 = vmatprep.subr.bf16.mxu1 %v1068_v45  ;;  %v2627_v44 = vld [vmem:[%s3590_s3 + $0x38] ss:$12 sps:$4 sm:$0xff]   ;;  %v2628_v45 = vld [vmem:[%s3590_s3 + $0xdc] ss:$12 sps:$4 sm:$0xff]  }
 0x179   : > { %v879_v54 = vadd.f32 %v878_v51, %v493_v49  ;;  %v880_v55 = vpop.f32.mrb[67].mxu0  ;;  %1645 = vmatpush1.bf16.msra.mxu0 %v1067_v43  ;;  %2354 = vmatpush1.bf16.msra.mxu1 %v1067_v43  ;;  %v957_v59 = vmax.f32 %v875_v47, 0.0  ;;  %v2626_v43 = vld [vmem:[%s3590_s3 + $0xc0] ss:$12 sps:$4 sm:$0xff]   ;;  %v2630_v46 = vld [vmem:[%s3590_s3 + $0xd8] ss:$12 sps:$4 sm:$0xff]  }
 0x17a   : > { %v881_v58 = vadd.f32 %v880_v55, %v493_v49  ;;  %v958_v61 = vmax.f32 %v877_v50, 0.0  ;;  %v2631_v47 = vld [vmem:[%s3590_s3 + $0x50] ss:$12 sps:$4 sm:$0xff]   ;;  %v2632_v48 = vld [vmem:[%s3590_s3 + $0xf4] ss:$12 sps:$4 sm:$0xff]  }
 0x17b   : > { %v959_v60 = vmax.f32 %v879_v54, 0.0  ;;  %v2634_v49 = vld [vmem:[%s3590_s3 + $0xf0] ss:$12 sps:$4 sm:$0xff]   ;;  %v2635_v50 = vld [vmem:[%s3590_s3 + $0x68] ss:$12 sps:$4 sm:$0xff]  }
 0x17c   : > { %v960_v62 = vmax.f32 %v881_v58, 0.0  ;;  %1647 = vmatmul.mubr.bf16.vlgmr.msra.gmra.mrb[72].mxu0 %v2580_v52  ;;  %1767 = vmatmul.mubr.bf16.vlgmr.msra.gmra.mrb[0].mxu1 %v2583_v53  ;;  %v2636_v51 = vld [vmem:[%s3590_s3 + $0x10c] ss:$12 sps:$4 sm:$0xff]   ;;  %v2638_v52 = vld [vmem:[%s3590_s3 + $0x108] ss:$12 sps:$4 sm:$0xff]  }
 0x17d   : > { %v1069_v63 = vpack.c.bf16 %v959_v60, %v957_v59  ;;  %1656 = vmatprep.mubr.bf16.mxu0 %v2586_v56  ;;  %1776 = vmatprep.mubr.bf16.mxu1 %v2588_v57  ;;  %v2639_v53 = vld [vmem:[%s3590_s3 + $0x80] ss:$12 sps:$4 sm:$0xff]   ;;  %v2640_v54 = vld [vmem:[%s3590_s3 + $0x98] ss:$12 sps:$4 sm:$0xff]   ;;  %v2641_v55 = vld [vmem:[%s3590_s3 + $0xb0] ss:$12 sps:$4 sm:$0xff]  }
 0x17e   : > { %v1070_v1 = vpack.c.bf16 %v960_v62, %v958_v61  ;;  %v884_v2 = vpop.f32.mrb[68].mxu0  ;;  %v2642_v56 = vld [vmem:[%s3590_s3 + $0xc8] ss:$12 sps:$4 sm:$0xff]   ;;  %v2643_v57 = vld [vmem:[%s3590_s3 + $0xe0] ss:$12 sps:$4 sm:$0xff]  }
 0x17f   : > { %v885_v4 = vadd.f32 %v884_v2, %v498_v0  ;;  %v886_v5 = vpop.f32.mrb[69].mxu0  ;;  %v2644_v58 = vld [vmem:[%s3590_s3 + $0xf8] ss:$12 sps:$4 sm:$0xff]   ;;  %v2645_v59 = vld [vmem:[%s3590_s3 + $0x110] ss:$12 sps:$4 sm:$0xff]  }
 0x180   : > { %v887_v7 = vadd.f32 %v886_v5, %v498_v0  ;;  %v888_v8 = vpop.f32.mrb[70].mxu0  ;;  %1827 = vmatprep.subr.bf16.mxu1 %v1070_v1  ;;  %v2646_v60 = vld [vmem:[%s3590_s3 + $0x128] ss:$12 sps:$4 sm:$0xff]   ;;  %v2647_v61 = vld [vmem:[%s3590_s3 + $0x140] ss:$12 sps:$4 sm:$0xff]  }
 0x181   : > { %v889_v11 = vadd.f32 %v888_v8, %v503_v6  ;;  %v890_v12 = vpop.f32.mrb[71].mxu0  ;;  %1828 = vmatpush1.bf16.msra.mxu1 %v1069_v63  ;;  %v961_v16 = vmax.f32 %v885_v4, 0.0  ;;  %v2648_v62 = vld [vmem:[%s3590_s3 + $0x158] ss:$12 sps:$4 sm:$0xff]   ;;  %v2649_v63 = vld [vmem:[%s3590_s3 + $0x170] ss:$12 sps:$4 sm:$0xff]  }
 0x182   : > { %v891_v15 = vadd.f32 %v890_v12, %v503_v6  ;;  %v962_v18 = vmax.f32 %v887_v7, 0.0  ;;  %v2650_v0 = vld [vmem:[%s3590_s3 + $0x188] ss:$12 sps:$4 sm:$0xff]   ;;  %v2651_v1 = vld [vmem:[%s3590_s3 + $0x1a0] ss:$12 sps:$4 sm:$0xff]  }
 0x183   : > { %v963_v17 = vmax.f32 %v889_v11, 0.0 }
 0x184   : > { %v964_v19 = vmax.f32 %v891_v15, 0.0  ;;  %1657 = vmatmul.mubr.bf16.gmra.mrb[76].mxu0 %v2590_v9  ;;  %1777 = vmatmul.mubr.bf16.gmra.mrb[4].mxu1 %v2591_v10 }
 0x185   : > { %v1071_v20 = vpack.c.bf16 %v963_v17, %v961_v16  ;;  %1666 = vmatprep.mubr.bf16.mxu0 %v2592_v13  ;;  %1786 = vmatprep.mubr.bf16.mxu1 %v2594_v14 }
 0x186   : > { %v1072_v21 = vpack.c.bf16 %v964_v19, %v962_v18 }
 0x188   : > { %1829 = vmatprep.subr.bf16.mxu1 %v1072_v21 }
 0x189   : > { %1830 = vmatpush1.bf16.msra.mxu1 %v1071_v20 }
 0x18c   : > { %1667 = vmatmul.mubr.bf16.gmra.mrb[80].mxu0 %v2596_v22  ;;  %1787 = vmatmul.mubr.bf16.gmra.mrb[8].mxu1 %v2597_v23 }
 0x18d   : > { %1676 = vmatprep.mubr.bf16.mxu0 %v2598_v24  ;;  %1796 = vmatprep.mubr.bf16.mxu1 %v2600_v25 }
 0x194   : > { %1677 = vmatmul.mubr.bf16.gmra.mrb[84].mxu0 %v2602_v26  ;;  %1797 = vmatmul.mubr.bf16.gmra.mrb[12].mxu1 %v2603_v27  ;;  %v1112_v26 = vpop.permute.xlu0 %1111  ;;  %v1117_v27 = vpop.permute.xlu1 %1116 }
 0x195   : > { %1686 = vmatprep.mubr.bf16.mxu0 %v2604_v28  ;;  %1806 = vmatprep.mubr.bf16.mxu1 %v2606_v29 }
 0x19c   : > { %1687 = vmatmul.mubr.bf16.gmra.mrb[88].mxu0 %v2608_v30  ;;  %1807 = vmatmul.mubr.bf16.gmra.mrb[16].mxu1 %v2609_v31 }
 0x19d   : > { %1696 = vmatprep.mubr.bf16.mxu0 %v2610_v32  ;;  %1816 = vmatprep.mubr.bf16.mxu1 %v2612_v33 }
 0x1a4   : > { %1697 = vmatmul.mubr.bf16.gmra.mrb[92].mxu0 %v2614_v34  ;;  %1817 = vmatmul.mubr.bf16.gmra.mrb[20].mxu1 %v2615_v35 }
 0x1a5   : > { %1706 = vmatprep.mubr.bf16.mxu0 %v2616_v36  ;;  %1859 = vmatprep.mubr.bf16.mxu1 %v2733_v3 }
 0x1ac   : > { %1707 = vmatmul.mubr.bf16.gmra.mrb[96].mxu0 %v2618_v37  ;;  %2302 = vmatmul.mubr.msk.bf16.vlgmr.msra.gmra.mrb[24].mxu1 %vm1559_vm2, %v2619_v38 }
 0x1ad   : > { %1716 = vmatprep.mubr.bf16.mxu0 %v2620_v39  ;;  %1869 = vmatprep.mubr.bf16.mxu1 %v2733_v3 }
 0x1b4   : > { %1717 = vmatmul.mubr.bf16.gmra.mrb[100].mxu0 %v2622_v40  ;;  %2303 = vmatmul.mubr.msk.bf16.gmra.mrb[28].mxu1 %vm1559_vm2, %v2623_v41 }
 0x1b5   : > { %1726 = vmatprep.mubr.bf16.mxu0 %v2624_v42  ;;  %1879 = vmatprep.mubr.bf16.mxu1 %v2733_v3 }
 0x1bc   : > { %1727 = vmatmul.mubr.bf16.gmra.mrb[104].mxu0 %v2626_v43  ;;  %2304 = vmatmul.mubr.msk.bf16.gmra.mrb[32].mxu1 %vm1559_vm2, %v2627_v44  ;;  %v1122_v44 = vpop.permute.xlu0 %1121 }
 0x1bd   : > { %1736 = vmatprep.mubr.bf16.mxu0 %v2628_v45  ;;  %1889 = vmatprep.mubr.bf16.mxu1 %v2733_v3  ;;  %v1127_v45 = vpop.permute.xlu1 %1126 }
 0x1c4   : > { %1737 = vmatmul.mubr.bf16.gmra.mrb[108].mxu0 %v2630_v46  ;;  %2305 = vmatmul.mubr.msk.bf16.gmra.mrb[36].mxu1 %vm1559_vm2, %v2631_v47 }
 0x1c5   : > { %1746 = vmatprep.mubr.bf16.mxu0 %v2632_v48  ;;  %1899 = vmatprep.mubr.bf16.mxu1 %v2733_v3 }
 0x1cc   : > { %1747 = vmatmul.mubr.bf16.gmra.mrb[112].mxu0 %v2634_v49  ;;  %2306 = vmatmul.mubr.msk.bf16.gmra.mrb[40].mxu1 %vm1559_vm2, %v2635_v50 }
 0x1cd   : > { %1756 = vmatprep.mubr.bf16.mxu0 %v2636_v51  ;;  %1909 = vmatprep.mubr.bf16.mxu1 %v2733_v3 }
 0x1d4   : > { %1757 = vmatmul.mubr.bf16.gmra.mrb[116].mxu0 %v2638_v52  ;;  %2307 = vmatmul.mubr.msk.bf16.gmra.mrb[44].mxu1 %vm1559_vm2, %v2639_v53 }
 0x1d5   : > { %1919 = vmatprep.mubr.bf16.mxu1 %v2733_v3 }
 0x1dc   : > { %2308 = vmatmul.mubr.msk.bf16.gmra.mrb[48].mxu1 %vm1559_vm2, %v2640_v54 }
 0x1dd   : > { %1929 = vmatprep.mubr.bf16.mxu1 %v2733_v3 }
 0x1e4   : > { %2309 = vmatmul.mubr.msk.bf16.gmra.mrb[52].mxu1 %vm1559_vm2, %v2641_v55 }
 0x1e5   : > { %1939 = vmatprep.mubr.bf16.mxu1 %v2733_v3 }
 0x1ec   : > { %2310 = vmatmul.mubr.msk.bf16.gmra.mrb[56].mxu1 %vm1559_vm2, %v2642_v56 }
 0x1ed   : > { %1949 = vmatprep.mubr.bf16.mxu1 %v2733_v3 }
 0x1f4   : > { %2311 = vmatmul.mubr.msk.bf16.gmra.mrb[60].mxu1 %vm1559_vm2, %v2643_v57 }
 0x1f5   : > { %1959 = vmatprep.mubr.bf16.mxu1 %v2733_v3 }
 0x1fc   : > { %2312 = vmatmul.mubr.msk.bf16.gmra.mrb[64].mxu1 %vm1559_vm2, %v2644_v58 }
 0x1fd   : > { %1969 = vmatprep.mubr.bf16.mxu1 %v2733_v3 }
 0x204   : > { %2313 = vmatmul.mubr.msk.bf16.gmra.mrb[68].mxu1 %vm1559_vm2, %v2645_v59 }
 0x205   : > { %1979 = vmatprep.mubr.bf16.mxu1 %v2733_v3 }
 0x20c   : > { %2314 = vmatmul.mubr.msk.bf16.gmra.mrb[0].mxu1 %vm1559_vm2, %v2646_v60 }
 0x20d   : > { %1989 = vmatprep.mubr.bf16.mxu1 %v2733_v3 }
 0x214   : > { %2315 = vmatmul.mubr.msk.bf16.gmra.mrb[4].mxu1 %vm1559_vm2, %v2647_v61 }
 0x215   : > { %1999 = vmatprep.mubr.bf16.mxu1 %v2733_v3 }
 0x21c   : > { %2316 = vmatmul.mubr.msk.bf16.gmra.mrb[8].mxu1 %vm1559_vm2, %v2648_v62  ;;  %v1132_v62 = vpop.permute.xlu0 %1131 }
 0x21d   : > { %2009 = vmatprep.mubr.bf16.mxu1 %v2733_v3 }
 0x224   : > { %2317 = vmatmul.mubr.msk.bf16.gmra.mrb[12].mxu1 %vm1559_vm2, %v2649_v63  ;;  %v1137_v63 = vpop.permute.xlu1 %1136 }
 0x225   : > { %2019 = vmatprep.mubr.bf16.mxu1 %v2733_v3 }
 0x22c   : > { %2318 = vmatmul.mubr.msk.bf16.gmra.mrb[16].mxu1 %vm1559_vm2, %v2650_v0 }
 0x22d   : > { %2029 = vmatprep.mubr.bf16.mxu1 %v2733_v3 }
 0x234   : > { %2319 = vmatmul.mubr.msk.bf16.gmra.mrb[20].mxu1 %vm1559_vm2, %v2651_v1 }
 0x24f   : > { %v1648_v2 = vpop.f32.mrb[72].mxu0 }
 0x250   : > { %v1650_v4 = vpop.f32.mrb[73].mxu0  ;;  %v1649_v28 = vadd.f32 %v1648_v2, %v1112_v26 }
 0x251   : > { %v1652_v5 = vpop.f32.mrb[74].mxu0  ;;  %v1651_v29 = vadd.f32 %v1650_v4, %v1112_v26 }
 0x252   : > { %v1654_v6 = vpop.f32.mrb[75].mxu0  ;;  %v1653_v32 = vadd.f32 %v1652_v5, %v1117_v27 }
 0x253   : > { %v1655_v36 = vadd.f32 %v1654_v6, %v1117_v27 }
 0x257   : > { %v1658_v7 = vpop.f32.mrb[76].mxu0 }
 0x258   : > { %v1660_v8 = vpop.f32.mrb[77].mxu0  ;;  %v1659_v46 = vadd.f32 %v1658_v7, %v1122_v44 }
 0x259   : > { %v1662_v9 = vpop.f32.mrb[78].mxu0  ;;  %v1661_v47 = vadd.f32 %v1660_v8, %v1122_v44 }
 0x25a   : > { %v1664_v10 = vpop.f32.mrb[79].mxu0  ;;  %v1663_v50 = vadd.f32 %v1662_v9, %v1127_v45 }
 0x25b   : > { %v1665_v54 = vadd.f32 %v1664_v10, %v1127_v45 }
 0x25f   : > { %v3333_v11 = vpop.f32.mrb[80].mxu0 }
 0x260   : > { %v3335_v12 = vpop.f32.mrb[81].mxu0  ;;  %v1669_v0 = vadd.f32 %v3333_v11, %v1132_v62 }
 0x261   : > { %v3337_v3 = vpop.f32.mrb[82].mxu0  ;;  %v1671_v1 = vadd.f32 %v3335_v12, %v1132_v62 }
 0x262   : > { %v3339_v13 = vpop.f32.mrb[83].mxu0  ;;  %v1673_v5 = vadd.f32 %v3337_v3, %v1137_v63  ;;  %v1142_v3 = vpop.permute.xlu0 %1141 }
 0x263   : > { %v1675_v9 = vadd.f32 %v3339_v13, %v1137_v63 }
 0x267   : > { %v3341_v14 = vpop.f32.mrb[84].mxu0 }
 0x268   : > { %v3343_v15 = vpop.f32.mrb[85].mxu0 }
 0x269   : > { %v3345_v16 = vpop.f32.mrb[86].mxu0  ;;  %v1681_v13 = vadd.f32 %v3343_v15, %v1142_v3 }
 0x26a   : > { %v3347_v17 = vpop.f32.mrb[87].mxu0 }
 0x26f   : > { %v3349_v18 = vpop.f32.mrb[88].mxu0 }
 0x270   : > { %v3351_v19 = vpop.f32.mrb[89].mxu0 }
 0x271   : > { %v3353_v20 = vpop.f32.mrb[90].mxu0 }
 0x272   : > { %v3355_v21 = vpop.f32.mrb[91].mxu0 }
 0x277   : > { %v3357_v22 = vpop.f32.mrb[92].mxu0 }
 0x278   : > { %v3359_v23 = vpop.f32.mrb[93].mxu0 }
 0x279   : > { %v3362_v24 = vpop.f32.mrb[94].mxu0 }
 0x27a   : > { %v3364_v25 = vpop.f32.mrb[95].mxu0 }
 0x27f   : > { %v3368_v30 = vpop.f32.mrb[96].mxu0  ;;  %v1861_v31 = vpop.f32.mrb[24].mxu1 }
 0x280   : > { %v1862_v33 = vadd.f32 %v1861_v31, %v1649_v28  ;;  %v3370_v34 = vpop.f32.mrb[97].mxu0  ;;  %v1863_v35 = vpop.f32.mrb[25].mxu1 }
 0x281   : > { %v1864_v37 = vadd.f32 %v1863_v35, %v1651_v29  ;;  %v3372_v38 = vpop.f32.mrb[98].mxu0  ;;  %v1865_v39 = vpop.f32.mrb[26].mxu1 }
 0x282   : > { %2040 = vst [vmem:[%s3374_s17] sm:$0xff] %v1862_v33  ;;  %v1866_v40 = vadd.f32 %v1865_v39, %v1653_v32  ;;  %v3377_v41 = vpop.f32.mrb[99].mxu0  ;;  %v1867_v42 = vpop.f32.mrb[27].mxu1  ;;  %v1679_v32 = vadd.f32 %v3341_v14, %v1142_v3 }
 0x283   : > { %2041 = vst [vmem:[%s3374_s17 + $0x8] sm:$0xff] %v1864_v37  ;;  %v1868_v43 = vadd.f32 %v1867_v42, %v1655_v36  ;;  %v1147_v31 = vpop.permute.xlu1 %1146 }
 0x284   : > { %2042 = vst [vmem:[%s3374_s17 + $0x10] sm:$0xff] %v1866_v40  ;;  %v1683_v36 = vadd.f32 %v3345_v16, %v1147_v31  ;;  %v1685_v42 = vadd.f32 %v3347_v17, %v1147_v31  ;;  %v1152_v16 = vpop.permute.xlu0 %1151 }
 0x285   : > { %2043 = vst [vmem:[%s3374_s17 + $0x18] sm:$0xff] %v1868_v43  ;;  %v1691_v17 = vadd.f32 %v3351_v19, %v1152_v16 }
 0x287   : > { %v3382_v48 = vpop.f32.mrb[100].mxu0  ;;  %v1871_v49 = vpop.f32.mrb[28].mxu1 }
 0x288   : > { %v1872_v51 = vadd.f32 %v1871_v49, %v1659_v46  ;;  %v3384_v52 = vpop.f32.mrb[101].mxu0  ;;  %v1873_v53 = vpop.f32.mrb[29].mxu1 }
 0x289   : > { %v1874_v55 = vadd.f32 %v1873_v53, %v1661_v47  ;;  %v3386_v56 = vpop.f32.mrb[102].mxu0  ;;  %v1875_v57 = vpop.f32.mrb[30].mxu1 }
 0x28a   : > { %2044 = vst [vmem:[%s3374_s17 + $0x20] sm:$0xff] %v1872_v51  ;;  %v1876_v58 = vadd.f32 %v1875_v57, %v1663_v50  ;;  %v3389_v59 = vpop.f32.mrb[103].mxu0  ;;  %v1877_v60 = vpop.f32.mrb[31].mxu1  ;;  %v1689_v50 = vadd.f32 %v3349_v18, %v1152_v16 }
 0x28b   : > { %2045 = vst [vmem:[%s3374_s17 + $0x28] sm:$0xff] %v1874_v55  ;;  %v1878_v61 = vadd.f32 %v1877_v60, %v1665_v54  ;;  %v1157_v49 = vpop.permute.xlu1 %1156 }
 0x28c   : > { %2046 = vst [vmem:[%s3374_s17 + $0x30] sm:$0xff] %v1876_v58  ;;  %v1693_v54 = vadd.f32 %v3353_v20, %v1157_v49  ;;  %v1695_v60 = vadd.f32 %v3355_v21, %v1157_v49  ;;  %v1162_v20 = vpop.permute.xlu0 %1161 }
 0x28d   : > { %2047 = vst [vmem:[%s3374_s17 + $0x38] sm:$0xff] %v1878_v61  ;;  %v1701_v21 = vadd.f32 %v3359_v23, %v1162_v20 }
 0x28f   : > { %v3396_v2 = vpop.f32.mrb[104].mxu0  ;;  %v1881_v4 = vpop.f32.mrb[32].mxu1 }
 0x290   : > { %v1882_v6 = vadd.f32 %v1881_v4, %v1669_v0  ;;  %v3399_v7 = vpop.f32.mrb[105].mxu0  ;;  %v1883_v8 = vpop.f32.mrb[33].mxu1 }
 0x291   : > { %v1884_v10 = vadd.f32 %v1883_v8, %v1671_v1  ;;  %v3402_v26 = vpop.f32.mrb[106].mxu0  ;;  %v1885_v11 = vpop.f32.mrb[34].mxu1 }
 0x292   : > { %2048 = vst [vmem:[%s3374_s17 + $0x40] sm:$0xff] %v1882_v6  ;;  %v1886_v27 = vadd.f32 %v1885_v11, %v1673_v5  ;;  %v3405_v12 = vpop.f32.mrb[107].mxu0  ;;  %v1887_v28 = vpop.f32.mrb[35].mxu1  ;;  %v1699_v5 = vadd.f32 %v3357_v22, %v1162_v20 }
 0x293   : > { %2049 = vst [vmem:[%s3374_s17 + $0x48] sm:$0xff] %v1884_v10  ;;  %v1888_v29 = vadd.f32 %v1887_v28, %v1675_v9  ;;  %v1167_v4 = vpop.permute.xlu1 %1166 }
 0x294   : > { %2050 = vst [vmem:[%s3374_s17 + $0x50] sm:$0xff] %v1886_v27  ;;  %v1703_v9 = vadd.f32 %v3362_v24, %v1167_v4  ;;  %v1705_v28 = vadd.f32 %v3364_v25, %v1167_v4  ;;  %v1172_v24 = vpop.permute.xlu0 %1171 }
 0x295   : > { %2051 = vst [vmem:[%s3374_s17 + $0x58] sm:$0xff] %v1888_v29 }
 0x297   : > { %v3412_v33 = vpop.f32.mrb[108].mxu0  ;;  %v1891_v35 = vpop.f32.mrb[36].mxu1 }
 0x298   : > { %v1892_v37 = vadd.f32 %v1891_v35, %v1679_v32  ;;  %v3415_v39 = vpop.f32.mrb[109].mxu0  ;;  %v1893_v40 = vpop.f32.mrb[37].mxu1  ;;  %v1709_v35 = vadd.f32 %v3368_v30, %v1172_v24 }
 0x299   : > { %v1894_v43 = vadd.f32 %v1893_v40, %v1681_v13  ;;  %v3418_v44 = vpop.f32.mrb[110].mxu0  ;;  %v1895_v14 = vpop.f32.mrb[38].mxu1 }
 0x29a   : > { %2052 = vst [vmem:[%s3374_s17 + $0x60] sm:$0xff] %v1892_v37  ;;  %v1896_v45 = vadd.f32 %v1895_v14, %v1683_v36  ;;  %v3421_v15 = vpop.f32.mrb[111].mxu0  ;;  %v1897_v46 = vpop.f32.mrb[39].mxu1  ;;  %v1711_v36 = vadd.f32 %v3370_v34, %v1172_v24 }
 0x29b   : > { %2053 = vst [vmem:[%s3374_s17 + $0x68] sm:$0xff] %v1894_v43  ;;  %v1898_v47 = vadd.f32 %v1897_v46, %v1685_v42  ;;  %v1177_v25 = vpop.permute.xlu1 %1176  ;;  %v1182_v30 = vpop.permute.xlu0 %1181 }
 0x29c   : > { %2054 = vst [vmem:[%s3374_s17 + $0x70] sm:$0xff] %v1896_v45  ;;  %v1713_v40 = vadd.f32 %v3372_v38, %v1177_v25  ;;  %v1715_v14 = vadd.f32 %v3377_v41, %v1177_v25  ;;  %v1719_v34 = vadd.f32 %v3382_v48, %v1182_v30 }
 0x29d   : > { %2055 = vst [vmem:[%s3374_s17 + $0x78] sm:$0xff] %v1898_v47 }
 0x29f   : > { %v3428_v51 = vpop.f32.mrb[112].mxu0  ;;  %v1901_v53 = vpop.f32.mrb[40].mxu1 }
 0x2a0   : > { %v1902_v55 = vadd.f32 %v1901_v53, %v1689_v50  ;;  %v3431_v57 = vpop.f32.mrb[113].mxu0  ;;  %v1903_v58 = vpop.f32.mrb[41].mxu1  ;;  %v1721_v50 = vadd.f32 %v3384_v52, %v1182_v30 }
 0x2a1   : > { %v1904_v61 = vadd.f32 %v1903_v58, %v1691_v17  ;;  %v3434_v62 = vpop.f32.mrb[114].mxu0  ;;  %v1905_v18 = vpop.f32.mrb[42].mxu1 }
 0x2a2   : > { %2056 = vst [vmem:[%s3374_s17 + $0x80] sm:$0xff] %v1902_v55  ;;  %v1906_v63 = vadd.f32 %v1905_v18, %v1693_v54  ;;  %v3437_v19 = vpop.f32.mrb[115].mxu0  ;;  %v1907_v0 = vpop.f32.mrb[43].mxu1 }
 0x2a3   : > { %2057 = vst [vmem:[%s3374_s17 + $0x88] sm:$0xff] %v1904_v61  ;;  %v1908_v1 = vadd.f32 %v1907_v0, %v1695_v60  ;;  %v1187_v38 = vpop.permute.xlu1 %1186  ;;  %v1192_v48 = vpop.permute.xlu0 %1191 }
 0x2a4   : > { %2058 = vst [vmem:[%s3374_s17 + $0x90] sm:$0xff] %v1906_v63  ;;  %v1723_v17 = vadd.f32 %v3386_v56, %v1187_v38  ;;  %v1725_v55 = vadd.f32 %v3389_v59, %v1187_v38  ;;  %v1729_v52 = vadd.f32 %v3396_v2, %v1192_v48  ;;  %v1731_v0 = vadd.f32 %v3399_v7, %v1192_v48 }
 0x2a5   : > { %2059 = vst [vmem:[%s3374_s17 + $0x98] sm:$0xff] %v1908_v1 }
 0x2a7   : > { %v3444_v6 = vpop.f32.mrb[116].mxu0  ;;  %v1911_v8 = vpop.f32.mrb[44].mxu1 }
 0x2a8   : > { %v1912_v10 = vadd.f32 %v1911_v8, %v1699_v5  ;;  %v3447_v11 = vpop.f32.mrb[117].mxu0  ;;  %v1913_v27 = vpop.f32.mrb[45].mxu1 }
 0x2a9   : > { %v1914_v29 = vadd.f32 %v1913_v27, %v1701_v21  ;;  %v3450_v3 = vpop.f32.mrb[118].mxu0  ;;  %v1915_v22 = vpop.f32.mrb[46].mxu1 }
 0x2aa   : > { %2060 = vst [vmem:[%s3374_s17 + $0xa0] sm:$0xff] %v1912_v10  ;;  %v1916_v31 = vadd.f32 %v1915_v22, %v1703_v9  ;;  %v3453_v23 = vpop.f32.mrb[119].mxu0  ;;  %v1917_v32 = vpop.f32.mrb[47].mxu1 }
 0x2ab   : > { %2061 = vst [vmem:[%s3374_s17 + $0xa8] sm:$0xff] %v1914_v29  ;;  %v1918_v13 = vadd.f32 %v1917_v32, %v1705_v28  ;;  %v1197_v56 = vpop.permute.xlu1 %1196  ;;  %v1202_v2 = vpop.permute.xlu0 %1201 }
 0x2ac   : > { %2062 = vst [vmem:[%s3374_s17 + $0xb0] sm:$0xff] %v1916_v31  ;;  %v1733_v1 = vadd.f32 %v3402_v26, %v1197_v56  ;;  %v1735_v5 = vadd.f32 %v3405_v12, %v1197_v56  ;;  %v1739_v7 = vadd.f32 %v3412_v33, %v1202_v2  ;;  %v1741_v28 = vadd.f32 %v3415_v39, %v1202_v2 }
 0x2ad   : > { %2063 = vst [vmem:[%s3374_s17 + $0xb8] sm:$0xff] %v1918_v13 }
 0x2af   : > { %v1921_v37 = vpop.f32.mrb[48].mxu1  ;;  %v1207_v26 = vpop.permute.xlu1 %1206 }
 0x2b0   : > { %v1922_v42 = vadd.f32 %v1921_v37, %v1709_v35  ;;  %v1923_v43 = vpop.f32.mrb[49].mxu1  ;;  %v1743_v29 = vadd.f32 %v3418_v44, %v1207_v26  ;;  %v1745_v32 = vadd.f32 %v3421_v15, %v1207_v26  ;;  %v1212_v33 = vpop.permute.xlu0 %1211 }
 0x2b1   : > { %v1924_v45 = vadd.f32 %v1923_v43, %v1711_v36  ;;  %v1925_v46 = vpop.f32.mrb[50].mxu1  ;;  %v1749_v39 = vadd.f32 %v3428_v51, %v1212_v33  ;;  %v1751_v37 = vadd.f32 %v3431_v57, %v1212_v33 }
 0x2b2   : > { %2064 = vst [vmem:[%s3374_s17 + $0xc0] sm:$0xff] %v1922_v42  ;;  %v1926_v47 = vadd.f32 %v1925_v46, %v1713_v40  ;;  %v1927_v16 = vpop.f32.mrb[51].mxu1 }
 0x2b3   : > { %2065 = vst [vmem:[%s3374_s17 + $0xc8] sm:$0xff] %v1924_v45  ;;  %v1928_v49 = vadd.f32 %v1927_v16, %v1715_v14  ;;  %v1217_v44 = vpop.permute.xlu1 %1216 }
 0x2b4   : > { %2066 = vst [vmem:[%s3374_s17 + $0xd0] sm:$0xff] %v1926_v47  ;;  %v1753_v40 = vadd.f32 %v3434_v62, %v1217_v44  ;;  %v1755_v14 = vadd.f32 %v3437_v19, %v1217_v44  ;;  %v1222_v51 = vpop.permute.xlu0 %1221 }
 0x2b5   : > { %2067 = vst [vmem:[%s3374_s17 + $0xd8] sm:$0xff] %v1928_v49  ;;  %v1759_v57 = vadd.f32 %v3444_v6, %v1222_v51  ;;  %v1761_v30 = vadd.f32 %v3447_v11, %v1222_v51 }
 0x2b7   : > { %v1931_v41 = vpop.f32.mrb[52].mxu1  ;;  %v1227_v62 = vpop.permute.xlu1 %1226 }
 0x2b8   : > { %v1932_v53 = vadd.f32 %v1931_v41, %v1719_v34  ;;  %v1933_v54 = vpop.f32.mrb[53].mxu1  ;;  %v1763_v34 = vadd.f32 %v3450_v3, %v1227_v62  ;;  %v1765_v41 = vadd.f32 %v3453_v23, %v1227_v62  ;;  %v1232_v11 = vpop.permute.xlu0 %1231 }
 0x2b9   : > { %v1934_v58 = vadd.f32 %v1933_v54, %v1721_v50  ;;  %v1935_v60 = vpop.f32.mrb[54].mxu1 }
 0x2ba   : > { %2068 = vst [vmem:[%s3374_s17 + $0xe0] sm:$0xff] %v1932_v53  ;;  %v1936_v61 = vadd.f32 %v1935_v60, %v1723_v17  ;;  %v1937_v18 = vpop.f32.mrb[55].mxu1 }
 0x2bb   : > { %2069 = vst [vmem:[%s3374_s17 + $0xe8] sm:$0xff] %v1934_v58  ;;  %v1938_v63 = vadd.f32 %v1937_v18, %v1725_v55 }
 0x2bc   : > { %2070 = vst [vmem:[%s3374_s17 + $0xf0] sm:$0xff] %v1936_v61  ;;  %v1237_v61 = vpop.permute.xlu1 %1236  ;;  %v1242_v56 = vpop.permute.xlu0 %1241 }
 0x2bd   : > { %2071 = vst [vmem:[%s3374_s17 + $0xf8] sm:$0xff] %v1938_v63 }
 0x2bf   : > { %v1941_v59 = vpop.f32.mrb[56].mxu1 }
 0x2c0   : > { %v1942_v20 = vadd.f32 %v1941_v59, %v1729_v52  ;;  %v1943_v4 = vpop.f32.mrb[57].mxu1 }
 0x2c1   : > { %v1944_v21 = vadd.f32 %v1943_v4, %v1731_v0  ;;  %v1945_v8 = vpop.f32.mrb[58].mxu1 }
 0x2c2   : > { %2072 = vst [vmem:[%s3374_s17 + $0x100] sm:$0xff] %v1942_v20  ;;  %v1946_v9 = vadd.f32 %v1945_v8, %v1733_v1  ;;  %v1947_v10 = vpop.f32.mrb[59].mxu1  ;;  %v1247_v20 = vpop.permute.xlu1 %1246 }
 0x2c3   : > { %2073 = vst [vmem:[%s3374_s17 + $0x108] sm:$0xff] %v1944_v21  ;;  %v1948_v27 = vadd.f32 %v1947_v10, %v1735_v5  ;;  %v1252_v10 = vpop.permute.xlu0 %1251 }
 0x2c4   : > { %2074 = vst [vmem:[%s3374_s17 + $0x110] sm:$0xff] %v1946_v9 }
 0x2c5   : > { %2075 = vst [vmem:[%s3374_s17 + $0x118] sm:$0xff] %v1948_v27 }
 0x2c6   : > { %v1257_v26 = vpop.permute.xlu1 %1256 }
 0x2c7   : > { %v1951_v12 = vpop.f32.mrb[60].mxu1 }
 0x2c8   : > { %v1952_v22 = vadd.f32 %v1951_v12, %v1739_v7  ;;  %v1953_v31 = vpop.f32.mrb[61].mxu1 }
 0x2c9   : > { %v1954_v13 = vadd.f32 %v1953_v31, %v1741_v28  ;;  %v1955_v24 = vpop.f32.mrb[62].mxu1 }
 0x2ca   : > { %2076 = vst [vmem:[%s3374_s17 + $0x120] sm:$0xff] %v1952_v22  ;;  %v1956_v35 = vadd.f32 %v1955_v24, %v1743_v29  ;;  %v1957_v25 = vpop.f32.mrb[63].mxu1 }
 0x2cb   : > { %2077 = vst [vmem:[%s3374_s17 + $0x128] sm:$0xff] %v1954_v13  ;;  %v1958_v36 = vadd.f32 %v1957_v25, %v1745_v32  ;;  %v1262_v32 = vpop.permute.xlu0 %1261  ;;  %v1267_v25 = vpop.permute.xlu1 %1266 }
 0x2cc   : > { %2078 = vst [vmem:[%s3374_s17 + $0x130] sm:$0xff] %v1956_v35 }
 0x2cd   : > { %2079 = vst [vmem:[%s3374_s17 + $0x138] sm:$0xff] %v1958_v36 }
 0x2cf   : > { %v1961_v15 = vpop.f32.mrb[64].mxu1 }
 0x2d0   : > { %v1962_v42 = vadd.f32 %v1961_v15, %v1749_v39  ;;  %v1963_v43 = vpop.f32.mrb[65].mxu1  ;;  %v1272_v15 = vpop.permute.xlu0 %1271 }
 0x2d1   : > { %v1964_v45 = vadd.f32 %v1963_v43, %v1751_v37  ;;  %v1965_v46 = vpop.f32.mrb[66].mxu1 }
 0x2d2   : > { %2080 = vst [vmem:[%s3374_s17 + $0x140] sm:$0xff] %v1962_v42  ;;  %v1966_v47 = vadd.f32 %v1965_v46, %v1753_v40  ;;  %v1967_v16 = vpop.f32.mrb[67].mxu1 }
 0x2d3   : > { %2081 = vst [vmem:[%s3374_s17 + $0x148] sm:$0xff] %v1964_v45  ;;  %v1968_v49 = vadd.f32 %v1967_v16, %v1755_v14  ;;  %v1277_v14 = vpop.permute.xlu1 %1276 }
 0x2d4   : > { %2082 = vst [vmem:[%s3374_s17 + $0x150] sm:$0xff] %v1966_v47  ;;  %v1282_v51 = vpop.permute.xlu0 %1281 }
 0x2d5   : > { %2083 = vst [vmem:[%s3374_s17 + $0x158] sm:$0xff] %v1968_v49 }
 0x2d7   : > { %v1971_v19 = vpop.f32.mrb[68].mxu1 }
 0x2d8   : > { %v1972_v38 = vadd.f32 %v1971_v19, %v1759_v57  ;;  %v1973_v50 = vpop.f32.mrb[69].mxu1  ;;  %v1287_v19 = vpop.permute.xlu1 %1286 }
 0x2d9   : > { %v1974_v17 = vadd.f32 %v1973_v50, %v1761_v30  ;;  %v1975_v53 = vpop.f32.mrb[70].mxu1 }
 0x2da   : > { %2084 = vst [vmem:[%s3374_s17 + $0x160] sm:$0xff] %v1972_v38  ;;  %v1976_v54 = vadd.f32 %v1975_v53, %v1763_v34  ;;  %v1977_v55 = vpop.f32.mrb[71].mxu1 }
 0x2db   : > { %2085 = vst [vmem:[%s3374_s17 + $0x168] sm:$0xff] %v1974_v17  ;;  %v1978_v6 = vadd.f32 %v1977_v55, %v1765_v41 }
 0x2dc   : > { %2086 = vst [vmem:[%s3374_s17 + $0x170] sm:$0xff] %v1976_v54 }
 0x2dd   : > { %2087 = vst [vmem:[%s3374_s17 + $0x178] sm:$0xff] %v1978_v6 }
 0x2df   : > { %v1981_v58 = vpop.f32.mrb[0].mxu1 }
 0x2e0   : > { %v2451_v3 = vadd.f32 %v1981_v58, %v1232_v11  ;;  %v1983_v60 = vpop.f32.mrb[1].mxu1 }
 0x2e1   : > { %v2452_v18 = vadd.f32 %v1983_v60, %v1232_v11  ;;  %v1985_v23 = vpop.f32.mrb[2].mxu1 }
 0x2e2   : > { %2088 = vst [vmem:[%s3374_s17 + $0x180] sm:$0xff] %v2451_v3  ;;  %v2453_v63 = vadd.f32 %v1985_v23, %v1237_v61  ;;  %v1987_v48 = vpop.f32.mrb[3].mxu1 }
 0x2e3   : > { %2089 = vst [vmem:[%s3374_s17 + $0x188] sm:$0xff] %v2452_v18  ;;  %v2454_v52 = vadd.f32 %v1987_v48, %v1237_v61 }
 0x2e4   : > { %2090 = vst [vmem:[%s3374_s17 + $0x190] sm:$0xff] %v2453_v63 }
 0x2e5   : > { %2091 = vst [vmem:[%s3374_s17 + $0x198] sm:$0xff] %v2454_v52 }
 0x2e7   : > { %v1991_v0 = vpop.f32.mrb[4].mxu1 }
 0x2e8   : > { %v2455_v59 = vadd.f32 %v1991_v0, %v1242_v56  ;;  %v1993_v1 = vpop.f32.mrb[5].mxu1 }
 0x2e9   : > { %v2456_v4 = vadd.f32 %v1993_v1, %v1242_v56  ;;  %v1995_v5 = vpop.f32.mrb[6].mxu1 }
 0x2ea   : > { %2092 = vst [vmem:[%s3374_s17 + $0x1a0] sm:$0xff] %v2455_v59  ;;  %v2457_v21 = vadd.f32 %v1995_v5, %v1247_v20  ;;  %v1997_v8 = vpop.f32.mrb[7].mxu1 }
 0x2eb   : > { %2093 = vst [vmem:[%s3374_s17 + $0x1a8] sm:$0xff] %v2456_v4  ;;  %v2458_v9 = vadd.f32 %v1997_v8, %v1247_v20 }
 0x2ec   : > { %2094 = vst [vmem:[%s3374_s17 + $0x1b0] sm:$0xff] %v2457_v21 }
 0x2ed   : > { %2095 = vst [vmem:[%s3374_s17 + $0x1b8] sm:$0xff] %v2458_v9 }
 0x2ef   : > { %v2001_v27 = vpop.f32.mrb[8].mxu1 }
 0x2f0   : > { %v2459_v2 = vadd.f32 %v2001_v27, %v1252_v10  ;;  %v2003_v7 = vpop.f32.mrb[9].mxu1 }
 0x2f1   : > { %v2460_v28 = vadd.f32 %v2003_v7, %v1252_v10  ;;  %v2005_v12 = vpop.f32.mrb[10].mxu1 }
 0x2f2   : > { %2096 = vst [vmem:[%s3374_s17 + $0x1c0] sm:$0xff] %v2459_v2  ;;  %v2461_v29 = vadd.f32 %v2005_v12, %v1257_v26  ;;  %v2007_v22 = vpop.f32.mrb[11].mxu1 }
 0x2f3   : > { %2097 = vst [vmem:[%s3374_s17 + $0x1c8] sm:$0xff] %v2460_v28  ;;  %v2462_v31 = vadd.f32 %v2007_v22, %v1257_v26 }
 0x2f4   : > { %2098 = vst [vmem:[%s3374_s17 + $0x1d0] sm:$0xff] %v2461_v29 }
 0x2f5   : > { %2099 = vst [vmem:[%s3374_s17 + $0x1d8] sm:$0xff] %v2462_v31 }
 0x2f7   : > { %v2011_v13 = vpop.f32.mrb[12].mxu1 }
 0x2f8   : > { %v2463_v24 = vadd.f32 %v2011_v13, %v1262_v32  ;;  %v2013_v35 = vpop.f32.mrb[13].mxu1 }
 0x2f9   : > { %v2464_v36 = vadd.f32 %v2013_v35, %v1262_v32  ;;  %v2015_v33 = vpop.f32.mrb[14].mxu1 }
 0x2fa   : > { %2100 = vst [vmem:[%s3374_s17 + $0x1e0] sm:$0xff] %v2463_v24  ;;  %v2465_v39 = vadd.f32 %v2015_v33, %v1267_v25  ;;  %v2017_v44 = vpop.f32.mrb[15].mxu1 }
 0x2fb   : > { %2101 = vst [vmem:[%s3374_s17 + $0x1e8] sm:$0xff] %v2464_v36  ;;  %v2466_v37 = vadd.f32 %v2017_v44, %v1267_v25 }
 0x2fc   : > { %2102 = vst [vmem:[%s3374_s17 + $0x1f0] sm:$0xff] %v2465_v39 }
 0x2fd   : > { %2103 = vst [vmem:[%s3374_s17 + $0x1f8] sm:$0xff] %v2466_v37 }
 0x2ff   : > { %v2021_v40 = vpop.f32.mrb[16].mxu1 }
 0x300   : > { %v2467_v42 = vadd.f32 %v2021_v40, %v1272_v15  ;;  %v2023_v43 = vpop.f32.mrb[17].mxu1 }
 0x301   : > { %v2468_v45 = vadd.f32 %v2023_v43, %v1272_v15  ;;  %v2025_v46 = vpop.f32.mrb[18].mxu1 }
 0x302   : > { %2104 = vst [vmem:[%s3374_s17 + $0x200] sm:$0xff] %v2467_v42  ;;  %v2469_v47 = vadd.f32 %v2025_v46, %v1277_v14  ;;  %v2027_v16 = vpop.f32.mrb[19].mxu1 }
 0x303   : > { %2105 = vst [vmem:[%s3374_s17 + $0x208] sm:$0xff] %v2468_v45  ;;  %v2470_v49 = vadd.f32 %v2027_v16, %v1277_v14 }
 0x304   : > { %2106 = vst [vmem:[%s3374_s17 + $0x210] sm:$0xff] %v2469_v47 }
 0x305   : > { %2107 = vst [vmem:[%s3374_s17 + $0x218] sm:$0xff] %v2470_v49 }
 0x307   : > { %v2031_v57 = vpop.f32.mrb[20].mxu1 }
 0x308   : > { %v2471_v62 = vadd.f32 %v2031_v57, %v1282_v51  ;;  %v2033_v30 = vpop.f32.mrb[21].mxu1 }
 0x309   : > { %v2472_v34 = vadd.f32 %v2033_v30, %v1282_v51  ;;  %v2035_v38 = vpop.f32.mrb[22].mxu1 }
 0x30a   : > { %2108 = vst [vmem:[%s3374_s17 + $0x220] sm:$0xff] %v2471_v62  ;;  %v2473_v50 = vadd.f32 %v2035_v38, %v1287_v19  ;;  %v2037_v41 = vpop.f32.mrb[23].mxu1 }
 0x30b   : > { %2109 = vst [vmem:[%s3374_s17 + $0x228] sm:$0xff] %v2472_v34  ;;  %v2474_v17 = vadd.f32 %v2037_v41, %v1287_v19 }
 0x30c   : > { %2110 = vst [vmem:[%s3374_s17 + $0x230] sm:$0xff] %v2473_v50 }
 0x30d   : > { %2111 = vst [vmem:[%s3374_s17 + $0x238] sm:$0xff] %v2474_v17 }
 0x30e   : > { %2665 = shalt.err (!%p2662_p5)
}
 0x30f   : > { %s2666_s12 = scalar_lea.hbm %s3532_s7, 9216  ;;  %s2670_s15 = scalar_lea.hbm %s3592_s5, 18432 }
 0x310   : > { %p2667_p6 = scmp.ne.s32.totalorder %s3532_s7, %s2666_s12  ;;  %p2671_p10 = scmp.lt.u32.totalorder %s3532_s7, %s3592_s5 }
 0x311   : > { %p2672_p11 = scmp.lt.u32.totalorder %s2670_s15, %s2666_s12  ;;  %p2674_p13 = scmp.lt.u32.totalorder %s2666_s12, %s3532_s7 }
 0x312   : > { %p2668_p7 = pnand %p2667_p6, %p2807_p4 }
 0x313   : > { %p2673_p12 = por %p2672_p11, %p2671_p10 }
 0x314   : > { %p2669_p9 = pneg %p2668_p7 }
 0x315   : > { %p2675_p0 = por %p2674_p13, %p2673_p12 }
 0x317   : > { %p2676_p1 = pnand %p2675_p0, %p2669_p9 }
 0x319   : > { %2679 = shalt.err (!%p2676_p1)
}
 0x31a   : > { %s2735_s24 = smov 256   ;;  %s2736_s27 = smov 16  }
 0x31b   : > { %2501 = dma.vmem_to_hbm [thread:$0]  (%p2807_p4), %s3534_s25, 9216, %s3532_s7, %s3541_s21, %s2735_s24, %s2735_s24, %s2736_s27  }
 0x31c PF: > { %p2507_p2 = scmp.ge.s32.totalorder %s2730_s23, 2  ;;  %s2143_s29 = sand.u32 1, %s2710_s18  }
 0x31d   : > { %s2144_s8 = scalar_lea.sflag [#allocation3], %s2143_s29 }
 0x31e   : > { %p2504_p3 = pnand %p2507_p2, %p2814_p8 }
 0x320   : > { %2705 = dma.done.wait (!%p2504_p3), %s2144_s8, 9216  }
 0x321   : > { %2707 = vsyncadd (!%p2504_p3), %s2144_s8, 4294958080  ;;  %s18_s23 = sadd.s32 1, %s2730_s23   ;;  %s3595_s18 = smov %s2714_s19 }
 0x322   : > { %p15_p5 = scmp.ge.s32.totalorder %s18_s23, 4   ;;  %s3596_s19 = smov %s2718_s20 }
 0x323   : > { %s3597_s20 = smov %s2820_s6  ;;  %s3598_s21 = smov %s2726_s22 }
 0x324   : > { %s3599_s22 = smov %s3601_s26  ;;  %17 = sbr.rel (!%p15_p5) target bundleno = 4 (0x4), region = 75 }
 0x32b   :  { %2149 = vsyncpa [#allocation3], 1 }
 0x32c   :  { %2151 = vsyncpa [#allocation3 + $0x1], 1 }

</bundles_post_ra>
